<compile_context>
chip_gen: v6e
topology: v6e:2x2x1
jax: 0.10.0
libtpu: 0.0.40
codegen_flags: <defaults>
</compile_context>

<pallas_src>
import numpy as np

import jax
import jax.numpy as jnp
from jax.experimental import pallas as pl
from jax.experimental.pallas import tpu as pltpu

EPS = 1e-5  # PyTorch InstanceNorm2d default eps


def _round_up(x, m):
    return (x + m - 1) // m * m


# ---------------------------------------------------------------------------
# In-kernel building blocks
# ---------------------------------------------------------------------------
def _instnorm_gamma_relu(conv, gamma_col):
    """conv: (C, P) f32, gamma_col: (C, 1) f32.

    Biased-variance InstanceNorm2d(affine=False) * gamma, then ReLU.
    Single traversal: var = E[x^2] - mean^2, all f32.
    """
    inv_p = 1.0 / conv.shape[1]
    s1 = jnp.sum(conv, axis=1, keepdims=True)
    s2 = jnp.sum(conv * conv, axis=1, keepdims=True)
    mean = s1 * inv_p
    var = jnp.maximum(s2 * inv_p - mean * mean, 0.0)
    scale = gamma_col * jax.lax.rsqrt(var + EPS)      # gamma folded into scale
    return jnp.maximum((conv - mean) * scale, 0.0)


def _conv_from_sel(y, sel_ref, w_ref):
    """Stride-2 3x3 conv of a VMEM-resident activation via selection matmuls.

    y:       (Cin, P_prev) f32   previous activation (spatial flattened on lanes)
    sel_ref: (T, P_prev, P_out)  0/1 tap-selection matrices (zero-pad folded in)
    w_ref:   (T, Cout, Cin)      per-tap conv weights
    """
    T = sel_ref.shape[0]
    patch0 = jnp.dot(y, sel_ref[0], preferred_element_type=jnp.float32)
    acc = jnp.dot(w_ref[0], patch0, preferred_element_type=jnp.float32)
    for t in range(1, T):
        patch_t = jnp.dot(y, sel_ref[t], preferred_element_type=jnp.float32)
        acc = acc + jnp.dot(w_ref[t], patch_t, preferred_element_type=jnp.float32)
    return acc                                        # (Cout, P_out) f32


def _encoder_kernel(p0_ref, w0_ref, g0_ref, sel1_ref, w1_ref, g1_ref,
                    sel2_ref, w2_ref, g2_ref, out_ref):
    """One batch element through all three fused stages (everything in VMEM)."""
    # Stage 0: 7x7 s1 conv as one lane-dense im2col matmul (bf16 in, f32 acc).
    conv0 = jnp.dot(w0_ref[...], p0_ref[0],
                    preferred_element_type=jnp.float32)        # (C1, P0)
    y0 = _instnorm_gamma_relu(conv0, g0_ref[0])                # (C1, P0) f32

    # Stage 1: 3x3 s2 p1 — in-kernel im2col via selection matmuls.
    conv1 = _conv_from_sel(y0, sel1_ref, w1_ref)               # (C2, P1)
    y1 = _instnorm_gamma_relu(conv1, g1_ref[0])

    # Stage 2: 3x3 s2 p1.
    conv2 = _conv_from_sel(y1, sel2_ref, w2_ref)               # (C3, P2)
    out_ref[0] = _instnorm_gamma_relu(conv2, g2_ref[0])


# ---------------------------------------------------------------------------
# Host-side (wrapper) helpers
# ---------------------------------------------------------------------------
def _im2col_t(xpad, kh, kw, stride):
    """(N, C, Hp, Wp) -> (N, C*kh*kw, Ho*Wo); row order ci*kh*kw + ki*kw + kj."""
    N, C, Hp, Wp = xpad.shape
    Ho = (Hp - kh) // stride + 1
    Wo = (Wp - kw) // stride + 1
    cols = []
    for ki in range(kh):
        for kj in range(kw):
            cols.append(xpad[:, :, ki:ki + stride * (Ho - 1) + 1:stride,
                                   kj:kj + stride * (Wo - 1) + 1:stride])
    p = jnp.stack(cols, axis=2).reshape(N, C * kh * kw, Ho * Wo)
    return p, Ho, Wo


def _make_sel(Hi, Wi, k, stride, pad):
    """0/1 tap-selection matrices (k*k, Hi*Wi, Ho*Wo); zero padding folded in."""
    Ho = (Hi + 2 * pad - k) // stride + 1
    Wo = (Wi + 2 * pad - k) // stride + 1
    sel = np.zeros((k * k, Hi * Wi, Ho * Wo), np.float32)
    for ki in range(k):
        for kj in range(k):
            t = ki * k + kj
            for ho in range(Ho):
                hi = ho * stride + ki - pad
                if hi < 0 or hi >= Hi:
                    continue
                for wo in range(Wo):
                    wi = wo * stride + kj - pad
                    if wi < 0 or wi >= Wi:
                        continue
                    sel[t, hi * Wi + wi, ho * Wo + wo] = 1.0
    return jnp.asarray(sel), Ho, Wo


def cres_encoder_forward(x, s, params):
    """Forward pass of _cResEncoder. x: (N, nc, H, W), s: (N, ns, 1, 1)."""
    w0, w1, w2, wg0, wg1, wg2 = params
    N = x.shape[0]
    C1, _, k0, _ = w0.shape
    C2 = w1.shape[0]
    C3 = w2.shape[0]

    # Hoisted 1x1 "gamma" convs on the style vector (tiny matmuls, once each).
    s2d = s.reshape(s.shape[0], s.shape[1])
    g0 = jnp.einsum("ns,cs->nc", s2d, wg0[:, :, 0, 0]).reshape(N, C1, 1)
    g1 = jnp.einsum("ns,cs->nc", s2d, wg1[:, :, 0, 0]).reshape(N, C2, 1)
    g2 = jnp.einsum("ns,cs->nc", s2d, wg2[:, :, 0, 0]).reshape(N, C3, 1)

    # Stage 0: reflect-pad + im2col on the raw nc-channel input (kernel input
    # anyway). K padded only to the bf16 sublane multiple (16), not 128.
    xpad = jnp.pad(x, ((0, 0), (0, 0), (3, 3), (3, 3)), mode="reflect")
    p0, H0, W0 = _im2col_t(xpad, k0, k0, 1)                    # (N, K0, P0)
    K0, P0 = p0.shape[1], p0.shape[2]
    Kp0 = _round_up(K0, 16)
    p0 = jnp.pad(p0, ((0, 0), (0, Kp0 - K0), (0, 0))).astype(jnp.bfloat16)
    w0m = jnp.pad(w0.reshape(C1, K0), ((0, 0), (0, Kp0 - K0))).astype(jnp.bfloat16)

    # Stages 1/2: stride-2 3x3 convs done fully in-kernel from VMEM-resident
    # activations, using per-tap 0/1 selection matmuls (built once, host numpy).
    sel1, H1, W1 = _make_sel(H0, W0, 3, 2, 1)                  # (9, P0, P1)
    sel2, H2, W2 = _make_sel(H1, W1, 3, 2, 1)                  # (9, P1, P2)
    P1, P2 = H1 * W1, H2 * W2
    w1t = jnp.transpose(w1, (2, 3, 0, 1)).reshape(9, C2, C1)   # per-tap weights
    w2t = jnp.transpose(w2, (2, 3, 0, 1)).reshape(9, C3, C2)

    out = pl.pallas_call(
        _encoder_kernel,
        out_shape=jax.ShapeDtypeStruct((N, C3, P2), jnp.float32),
        grid=(N,),
        in_specs=[
            pl.BlockSpec((1, Kp0, P0), lambda n: (n, 0, 0)),   # stage-0 patches
            pl.BlockSpec((C1, Kp0), lambda n: (0, 0)),         # w0 (bf16 matrix)
            pl.BlockSpec((1, C1, 1), lambda n: (n, 0, 0)),     # gamma0
            pl.BlockSpec((9, P0, P1), lambda n: (0, 0, 0)),    # sel1
            pl.BlockSpec((9, C2, C1), lambda n: (0, 0, 0)),    # w1 per-tap
            pl.BlockSpec((1, C2, 1), lambda n: (n, 0, 0)),     # gamma1
            pl.BlockSpec((9, P1, P2), lambda n: (0, 0, 0)),    # sel2
            pl.BlockSpec((9, C3, C2), lambda n: (0, 0, 0)),    # w2 per-tap
            pl.BlockSpec((1, C3, 1), lambda n: (n, 0, 0)),     # gamma2
        ],
        out_specs=pl.BlockSpec((1, C3, P2), lambda n: (n, 0, 0)),
        compiler_params=pltpu.CompilerParams(
            dimension_semantics=("parallel",),                 # v7x: 2 TCs, 2 samples
            vmem_limit_bytes=32 * 1024 * 1024),
    )(p0, w0m, g0, sel1, w1t, g1, sel2, w2t, g2)

    # (N, C3, Ho*Wo) is already NCHW-contiguous: free reshape, no transpose.
    return out.reshape(N, C3, H2, W2)


# ---------------------------------------------------------------------------
# Pure-JAX reference (mirrors the PyTorch forward) for validation
# ---------------------------------------------------------------------------
def _reference(x, s, params):
    w0, w1, w2, wg0, wg1, wg2 = params

    def conv(inp, w, stride, pad):
        return jax.lax.conv_general_dilated(
            inp, w, (stride, stride), [(pad, pad), (pad, pad)],
            dimension_numbers=("NCHW", "OIHW", "NCHW"))

    def inorm(y):
        m = y.mean(axis=(2, 3), keepdims=True)
        v = jnp.square(y - m).mean(axis=(2, 3), keepdims=True)
        return (y - m) * jax.lax.rsqrt(v + EPS)

    x0 = jnp.pad(x, ((0, 0), (0, 0), (3, 3), (3, 3)), mode="reflect")
    y = jax.nn.relu(inorm(conv(x0, w0, 1, 0)) * conv(s, wg0, 1, 0))
    y = jax.nn.relu(inorm(conv(y, w1, 2, 1)) * conv(s, wg1, 1, 0))
    y = jax.nn.relu(inorm(conv(y, w2, 2, 1)) * conv(s, wg2, 1, 0))
    return y


if __name__ == "__main__":
    # Small shapes consistent with the module: nc=3, nf=32, ns=10, 16x16 input.
    N, nc, nf, ns, H, W = 2, 3, 32, 10, 16, 16
    key = jax.random.PRNGKey(0)
    ks = jax.random.split(key, 8)
    # Deterministic synthetic parameters (bias=False everywhere, per __init__).
    w0 = jax.random.normal(ks[0], (nf // 4, nc, 7, 7), jnp.float32) * 0.05
    w1 = jax.random.normal(ks[1], (nf // 2, nf // 4, 3, 3), jnp.float32) * 0.05
    w2 = jax.random.normal(ks[2], (nf, nf // 2, 3, 3), jnp.float32) * 0.05
    wg0 = jax.random.normal(ks[3], (nf // 4, ns, 1, 1), jnp.float32) * 0.1
    wg1 = jax.random.normal(ks[4], (nf // 2, ns, 1, 1), jnp.float32) * 0.1
    wg2 = jax.random.normal(ks[5], (nf, ns, 1, 1), jnp.float32) * 0.1
    x = jax.random.normal(ks[6], (N, nc, H, W), jnp.float32)
    s = jax.random.normal(ks[7], (N, ns, 1, 1), jnp.float32)
    params = (w0, w1, w2, wg0, wg1, wg2)

    out = jax.block_until_ready(jax.jit(cres_encoder_forward)(x, s, params))
    ref = jax.block_until_ready(_reference(x, s, params))

    assert out.shape == (N, nf, H // 4, W // 4), out.shape
    # Stage-0 conv runs on bf16 MXU operands (f32 accumulation) vs. the f32
    # reference -> loosened tolerance; stages 1/2 stay f32 in-kernel.
    err = float(jnp.max(jnp.abs(out - ref)))
    assert jnp.allclose(out, ref, atol=5e-2, rtol=5e-2), err
    print("KERNEL_OK")
</pallas_src>

<mosaic_0001>
module attributes {stable_mosaic.version = 11 : i64} {
  func.func @_encoder_kernel(%arg0: i32, %arg1: memref<1x160x256xbf16, #tpu.memory_space<vmem>>, %arg2: memref<8x160xbf16, #tpu.memory_space<vmem>>, %arg3: memref<1x8x1xf32, #tpu.memory_space<vmem>>, %arg4: memref<9x256x64xf32, #tpu.memory_space<vmem>>, %arg5: memref<9x16x8xf32, #tpu.memory_space<vmem>>, %arg6: memref<1x16x1xf32, #tpu.memory_space<vmem>>, %arg7: memref<9x64x16xf32, #tpu.memory_space<vmem>>, %arg8: memref<9x32x16xf32, #tpu.memory_space<vmem>>, %arg9: memref<1x32x1xf32, #tpu.memory_space<vmem>>, %arg10: memref<1x32x16xf32, #tpu.memory_space<vmem>>) attributes {dimension_semantics = [#tpu.dimension_semantics<parallel>], iteration_bounds = array<i64: 2>, scalar_prefetch = 0 : i64, scratch_operands = 0 : i64, tpu.core_type = #tpu.core_type<tc>, window_params = [{transform_indices = @transform_0, window_bounds = array<i64: 1, 160, 256>}, {pipeline_mode = #tpu.pipeline_mode<synchronous>, transform_indices = @transform_1, window_bounds = array<i64: 8, 160>}, {transform_indices = @transform_2, window_bounds = array<i64: 1, 8, 1>}, {pipeline_mode = #tpu.pipeline_mode<synchronous>, transform_indices = @transform_3, window_bounds = array<i64: 9, 256, 64>}, {pipeline_mode = #tpu.pipeline_mode<synchronous>, transform_indices = @transform_4, window_bounds = array<i64: 9, 16, 8>}, {transform_indices = @transform_5, window_bounds = array<i64: 1, 16, 1>}, {pipeline_mode = #tpu.pipeline_mode<synchronous>, transform_indices = @transform_6, window_bounds = array<i64: 9, 64, 16>}, {pipeline_mode = #tpu.pipeline_mode<synchronous>, transform_indices = @transform_7, window_bounds = array<i64: 9, 32, 16>}, {transform_indices = @transform_8, window_bounds = array<i64: 1, 32, 1>}, {transform_indices = @transform_9, window_bounds = array<i64: 1, 32, 16>}]} {
    %c0 = arith.constant 0 : index
    %c0_0 = arith.constant 0 : index
    %0 = vector.load %arg2[%c0, %c0_0] : memref<8x160xbf16, #tpu.memory_space<vmem>>, vector<8x160xbf16>
    %c0_1 = arith.constant 0 : index
    %c0_2 = arith.constant 0 : index
    %c0_3 = arith.constant 0 : index
    %1 = vector.load %arg1[%c0_1, %c0_2, %c0_3] : memref<1x160x256xbf16, #tpu.memory_space<vmem>>, vector<1x160x256xbf16>
    %2 = vector.shape_cast %1 : vector<1x160x256xbf16> to vector<160x256xbf16>
    %cst = arith.constant dense<0.000000e+00> : vector<8x256xf32>
    %3 = tpu.matmul %0, %2, %cst {dimension_numbers = #tpu.dot_dimension_numbers<[1], [0], [0], [1], [0, 0, 1, 1], [], []>} : vector<8x160xbf16>, vector<160x256xbf16>, vector<8x256xf32> -> vector<8x256xf32>
    %c0_4 = arith.constant 0 : index
    %c0_5 = arith.constant 0 : index
    %c0_6 = arith.constant 0 : index
    %4 = vector.load %arg3[%c0_4, %c0_5, %c0_6] : memref<1x8x1xf32, #tpu.memory_space<vmem>>, vector<1x8x1xf32>
    %5 = vector.shape_cast %4 : vector<1x8x1xf32> to vector<8x1xf32>
    %cst_7 = arith.constant dense<0.000000e+00> : vector<8xf32>
    %6 = vector.multi_reduction <add>, %3, %cst_7 [1] : vector<8x256xf32> to vector<8xf32>
    %7 = vector.shape_cast %6 : vector<8xf32> to vector<8x1xf32>
    %8 = arith.mulf %3, %3 : vector<8x256xf32>
    %cst_8 = arith.constant dense<0.000000e+00> : vector<8xf32>
    %9 = vector.multi_reduction <add>, %8, %cst_8 [1] : vector<8x256xf32> to vector<8xf32>
    %10 = vector.shape_cast %9 : vector<8xf32> to vector<8x1xf32>
    %cst_9 = arith.constant 3.906250e-03 : f32
    %11 = vector.broadcast %cst_9 : f32 to vector<8x1xf32>
    %12 = arith.mulf %7, %11 : vector<8x1xf32>
    %cst_10 = arith.constant 3.906250e-03 : f32
    %13 = vector.broadcast %cst_10 : f32 to vector<8x1xf32>
    %14 = arith.mulf %10, %13 : vector<8x1xf32>
    %15 = arith.mulf %12, %12 : vector<8x1xf32>
    %16 = arith.subf %14, %15 : vector<8x1xf32>
    %cst_11 = arith.constant 0.000000e+00 : f32
    %17 = vector.broadcast %cst_11 : f32 to vector<8x1xf32>
    %18 = arith.maximumf %16, %17 : vector<8x1xf32>
    %cst_12 = arith.constant 9.99999974E-6 : f32
    %19 = vector.broadcast %cst_12 : f32 to vector<8x1xf32>
    %20 = arith.addf %18, %19 : vector<8x1xf32>
    %21 = math.rsqrt %20 : vector<8x1xf32>
    %22 = arith.mulf %5, %21 : vector<8x1xf32>
    %23 = vector.broadcast %12 : vector<8x1xf32> to vector<8x256xf32>
    %24 = arith.subf %3, %23 : vector<8x256xf32>
    %25 = vector.broadcast %22 : vector<8x1xf32> to vector<8x256xf32>
    %26 = arith.mulf %24, %25 : vector<8x256xf32>
    %cst_13 = arith.constant 0.000000e+00 : f32
    %27 = vector.broadcast %cst_13 : f32 to vector<8x256xf32>
    %28 = arith.maximumf %26, %27 : vector<8x256xf32>
    %c0_14 = arith.constant 0 : index
    %c0_15 = arith.constant 0 : index
    %c0_16 = arith.constant 0 : index
    %29 = vector.load %arg4[%c0_14, %c0_15, %c0_16] : memref<9x256x64xf32, #tpu.memory_space<vmem>>, vector<1x256x64xf32>
    %30 = vector.shape_cast %29 : vector<1x256x64xf32> to vector<256x64xf32>
    %cst_17 = arith.constant dense<0.000000e+00> : vector<8x64xf32>
    %31 = tpu.matmul %28, %30, %cst_17 {dimension_numbers = #tpu.dot_dimension_numbers<[1], [0], [0], [1], [0, 0, 1, 1], [], []>} : vector<8x256xf32>, vector<256x64xf32>, vector<8x64xf32> -> vector<8x64xf32>
    %c0_18 = arith.constant 0 : index
    %c0_19 = arith.constant 0 : index
    %c0_20 = arith.constant 0 : index
    %32 = vector.load %arg5[%c0_18, %c0_19, %c0_20] : memref<9x16x8xf32, #tpu.memory_space<vmem>>, vector<1x16x8xf32>
    %33 = vector.shape_cast %32 : vector<1x16x8xf32> to vector<16x8xf32>
    %cst_21 = arith.constant dense<0.000000e+00> : vector<16x64xf32>
    %34 = tpu.matmul %33, %31, %cst_21 {dimension_numbers = #tpu.dot_dimension_numbers<[1], [0], [0], [1], [0, 0, 1, 1], [], []>} : vector<16x8xf32>, vector<8x64xf32>, vector<16x64xf32> -> vector<16x64xf32>
    %c1 = arith.constant 1 : index
    %c0_22 = arith.constant 0 : index
    %c0_23 = arith.constant 0 : index
    %35 = vector.load %arg4[%c1, %c0_22, %c0_23] : memref<9x256x64xf32, #tpu.memory_space<vmem>>, vector<1x256x64xf32>
    %36 = vector.shape_cast %35 : vector<1x256x64xf32> to vector<256x64xf32>
    %cst_24 = arith.constant dense<0.000000e+00> : vector<8x64xf32>
    %37 = tpu.matmul %28, %36, %cst_24 {dimension_numbers = #tpu.dot_dimension_numbers<[1], [0], [0], [1], [0, 0, 1, 1], [], []>} : vector<8x256xf32>, vector<256x64xf32>, vector<8x64xf32> -> vector<8x64xf32>
    %c1_25 = arith.constant 1 : index
    %c0_26 = arith.constant 0 : index
    %c0_27 = arith.constant 0 : index
    %38 = vector.load %arg5[%c1_25, %c0_26, %c0_27] : memref<9x16x8xf32, #tpu.memory_space<vmem>>, vector<1x16x8xf32>
    %39 = vector.shape_cast %38 : vector<1x16x8xf32> to vector<16x8xf32>
    %cst_28 = arith.constant dense<0.000000e+00> : vector<16x64xf32>
    %40 = tpu.matmul %39, %37, %cst_28 {dimension_numbers = #tpu.dot_dimension_numbers<[1], [0], [0], [1], [0, 0, 1, 1], [], []>} : vector<16x8xf32>, vector<8x64xf32>, vector<16x64xf32> -> vector<16x64xf32>
    %41 = arith.addf %34, %40 : vector<16x64xf32>
    %c2 = arith.constant 2 : index
    %c0_29 = arith.constant 0 : index
    %c0_30 = arith.constant 0 : index
    %42 = vector.load %arg4[%c2, %c0_29, %c0_30] : memref<9x256x64xf32, #tpu.memory_space<vmem>>, vector<1x256x64xf32>
    %43 = vector.shape_cast %42 : vector<1x256x64xf32> to vector<256x64xf32>
    %cst_31 = arith.constant dense<0.000000e+00> : vector<8x64xf32>
    %44 = tpu.matmul %28, %43, %cst_31 {dimension_numbers = #tpu.dot_dimension_numbers<[1], [0], [0], [1], [0, 0, 1, 1], [], []>} : vector<8x256xf32>, vector<256x64xf32>, vector<8x64xf32> -> vector<8x64xf32>
    %c2_32 = arith.constant 2 : index
    %c0_33 = arith.constant 0 : index
    %c0_34 = arith.constant 0 : index
    %45 = vector.load %arg5[%c2_32, %c0_33, %c0_34] : memref<9x16x8xf32, #tpu.memory_space<vmem>>, vector<1x16x8xf32>
    %46 = vector.shape_cast %45 : vector<1x16x8xf32> to vector<16x8xf32>
    %cst_35 = arith.constant dense<0.000000e+00> : vector<16x64xf32>
    %47 = tpu.matmul %46, %44, %cst_35 {dimension_numbers = #tpu.dot_dimension_numbers<[1], [0], [0], [1], [0, 0, 1, 1], [], []>} : vector<16x8xf32>, vector<8x64xf32>, vector<16x64xf32> -> vector<16x64xf32>
    %48 = arith.addf %41, %47 : vector<16x64xf32>
    %c3 = arith.constant 3 : index
    %c0_36 = arith.constant 0 : index
    %c0_37 = arith.constant 0 : index
    %49 = vector.load %arg4[%c3, %c0_36, %c0_37] : memref<9x256x64xf32, #tpu.memory_space<vmem>>, vector<1x256x64xf32>
    %50 = vector.shape_cast %49 : vector<1x256x64xf32> to vector<256x64xf32>
    %cst_38 = arith.constant dense<0.000000e+00> : vector<8x64xf32>
    %51 = tpu.matmul %28, %50, %cst_38 {dimension_numbers = #tpu.dot_dimension_numbers<[1], [0], [0], [1], [0, 0, 1, 1], [], []>} : vector<8x256xf32>, vector<256x64xf32>, vector<8x64xf32> -> vector<8x64xf32>
    %c3_39 = arith.constant 3 : index
    %c0_40 = arith.constant 0 : index
    %c0_41 = arith.constant 0 : index
    %52 = vector.load %arg5[%c3_39, %c0_40, %c0_41] : memref<9x16x8xf32, #tpu.memory_space<vmem>>, vector<1x16x8xf32>
    %53 = vector.shape_cast %52 : vector<1x16x8xf32> to vector<16x8xf32>
    %cst_42 = arith.constant dense<0.000000e+00> : vector<16x64xf32>
    %54 = tpu.matmul %53, %51, %cst_42 {dimension_numbers = #tpu.dot_dimension_numbers<[1], [0], [0], [1], [0, 0, 1, 1], [], []>} : vector<16x8xf32>, vector<8x64xf32>, vector<16x64xf32> -> vector<16x64xf32>
    %55 = arith.addf %48, %54 : vector<16x64xf32>
    %c4 = arith.constant 4 : index
    %c0_43 = arith.constant 0 : index
    %c0_44 = arith.constant 0 : index
    %56 = vector.load %arg4[%c4, %c0_43, %c0_44] : memref<9x256x64xf32, #tpu.memory_space<vmem>>, vector<1x256x64xf32>
    %57 = vector.shape_cast %56 : vector<1x256x64xf32> to vector<256x64xf32>
    %cst_45 = arith.constant dense<0.000000e+00> : vector<8x64xf32>
    %58 = tpu.matmul %28, %57, %cst_45 {dimension_numbers = #tpu.dot_dimension_numbers<[1], [0], [0], [1], [0, 0, 1, 1], [], []>} : vector<8x256xf32>, vector<256x64xf32>, vector<8x64xf32> -> vector<8x64xf32>
    %c4_46 = arith.constant 4 : index
    %c0_47 = arith.constant 0 : index
    %c0_48 = arith.constant 0 : index
    %59 = vector.load %arg5[%c4_46, %c0_47, %c0_48] : memref<9x16x8xf32, #tpu.memory_space<vmem>>, vector<1x16x8xf32>
    %60 = vector.shape_cast %59 : vector<1x16x8xf32> to vector<16x8xf32>
    %cst_49 = arith.constant dense<0.000000e+00> : vector<16x64xf32>
    %61 = tpu.matmul %60, %58, %cst_49 {dimension_numbers = #tpu.dot_dimension_numbers<[1], [0], [0], [1], [0, 0, 1, 1], [], []>} : vector<16x8xf32>, vector<8x64xf32>, vector<16x64xf32> -> vector<16x64xf32>
    %62 = arith.addf %55, %61 : vector<16x64xf32>
    %c5 = arith.constant 5 : index
    %c0_50 = arith.constant 0 : index
    %c0_51 = arith.constant 0 : index
    %63 = vector.load %arg4[%c5, %c0_50, %c0_51] : memref<9x256x64xf32, #tpu.memory_space<vmem>>, vector<1x256x64xf32>
    %64 = vector.shape_cast %63 : vector<1x256x64xf32> to vector<256x64xf32>
    %cst_52 = arith.constant dense<0.000000e+00> : vector<8x64xf32>
    %65 = tpu.matmul %28, %64, %cst_52 {dimension_numbers = #tpu.dot_dimension_numbers<[1], [0], [0], [1], [0, 0, 1, 1], [], []>} : vector<8x256xf32>, vector<256x64xf32>, vector<8x64xf32> -> vector<8x64xf32>
    %c5_53 = arith.constant 5 : index
    %c0_54 = arith.constant 0 : index
    %c0_55 = arith.constant 0 : index
    %66 = vector.load %arg5[%c5_53, %c0_54, %c0_55] : memref<9x16x8xf32, #tpu.memory_space<vmem>>, vector<1x16x8xf32>
    %67 = vector.shape_cast %66 : vector<1x16x8xf32> to vector<16x8xf32>
    %cst_56 = arith.constant dense<0.000000e+00> : vector<16x64xf32>
    %68 = tpu.matmul %67, %65, %cst_56 {dimension_numbers = #tpu.dot_dimension_numbers<[1], [0], [0], [1], [0, 0, 1, 1], [], []>} : vector<16x8xf32>, vector<8x64xf32>, vector<16x64xf32> -> vector<16x64xf32>
    %69 = arith.addf %62, %68 : vector<16x64xf32>
    %c6 = arith.constant 6 : index
    %c0_57 = arith.constant 0 : index
    %c0_58 = arith.constant 0 : index
    %70 = vector.load %arg4[%c6, %c0_57, %c0_58] : memref<9x256x64xf32, #tpu.memory_space<vmem>>, vector<1x256x64xf32>
    %71 = vector.shape_cast %70 : vector<1x256x64xf32> to vector<256x64xf32>
    %cst_59 = arith.constant dense<0.000000e+00> : vector<8x64xf32>
    %72 = tpu.matmul %28, %71, %cst_59 {dimension_numbers = #tpu.dot_dimension_numbers<[1], [0], [0], [1], [0, 0, 1, 1], [], []>} : vector<8x256xf32>, vector<256x64xf32>, vector<8x64xf32> -> vector<8x64xf32>
    %c6_60 = arith.constant 6 : index
    %c0_61 = arith.constant 0 : index
    %c0_62 = arith.constant 0 : index
    %73 = vector.load %arg5[%c6_60, %c0_61, %c0_62] : memref<9x16x8xf32, #tpu.memory_space<vmem>>, vector<1x16x8xf32>
    %74 = vector.shape_cast %73 : vector<1x16x8xf32> to vector<16x8xf32>
    %cst_63 = arith.constant dense<0.000000e+00> : vector<16x64xf32>
    %75 = tpu.matmul %74, %72, %cst_63 {dimension_numbers = #tpu.dot_dimension_numbers<[1], [0], [0], [1], [0, 0, 1, 1], [], []>} : vector<16x8xf32>, vector<8x64xf32>, vector<16x64xf32> -> vector<16x64xf32>
    %76 = arith.addf %69, %75 : vector<16x64xf32>
    %c7 = arith.constant 7 : index
    %c0_64 = arith.constant 0 : index
    %c0_65 = arith.constant 0 : index
    %77 = vector.load %arg4[%c7, %c0_64, %c0_65] : memref<9x256x64xf32, #tpu.memory_space<vmem>>, vector<1x256x64xf32>
    %78 = vector.shape_cast %77 : vector<1x256x64xf32> to vector<256x64xf32>
    %cst_66 = arith.constant dense<0.000000e+00> : vector<8x64xf32>
    %79 = tpu.matmul %28, %78, %cst_66 {dimension_numbers = #tpu.dot_dimension_numbers<[1], [0], [0], [1], [0, 0, 1, 1], [], []>} : vector<8x256xf32>, vector<256x64xf32>, vector<8x64xf32> -> vector<8x64xf32>
    %c7_67 = arith.constant 7 : index
    %c0_68 = arith.constant 0 : index
    %c0_69 = arith.constant 0 : index
    %80 = vector.load %arg5[%c7_67, %c0_68, %c0_69] : memref<9x16x8xf32, #tpu.memory_space<vmem>>, vector<1x16x8xf32>
    %81 = vector.shape_cast %80 : vector<1x16x8xf32> to vector<16x8xf32>
    %cst_70 = arith.constant dense<0.000000e+00> : vector<16x64xf32>
    %82 = tpu.matmul %81, %79, %cst_70 {dimension_numbers = #tpu.dot_dimension_numbers<[1], [0], [0], [1], [0, 0, 1, 1], [], []>} : vector<16x8xf32>, vector<8x64xf32>, vector<16x64xf32> -> vector<16x64xf32>
    %83 = arith.addf %76, %82 : vector<16x64xf32>
    %c8 = arith.constant 8 : index
    %c0_71 = arith.constant 0 : index
    %c0_72 = arith.constant 0 : index
    %84 = vector.load %arg4[%c8, %c0_71, %c0_72] : memref<9x256x64xf32, #tpu.memory_space<vmem>>, vector<1x256x64xf32>
    %85 = vector.shape_cast %84 : vector<1x256x64xf32> to vector<256x64xf32>
    %cst_73 = arith.constant dense<0.000000e+00> : vector<8x64xf32>
    %86 = tpu.matmul %28, %85, %cst_73 {dimension_numbers = #tpu.dot_dimension_numbers<[1], [0], [0], [1], [0, 0, 1, 1], [], []>} : vector<8x256xf32>, vector<256x64xf32>, vector<8x64xf32> -> vector<8x64xf32>
    %c8_74 = arith.constant 8 : index
    %c0_75 = arith.constant 0 : index
    %c0_76 = arith.constant 0 : index
    %87 = vector.load %arg5[%c8_74, %c0_75, %c0_76] : memref<9x16x8xf32, #tpu.memory_space<vmem>>, vector<1x16x8xf32>
    %88 = vector.shape_cast %87 : vector<1x16x8xf32> to vector<16x8xf32>
    %cst_77 = arith.constant dense<0.000000e+00> : vector<16x64xf32>
    %89 = tpu.matmul %88, %86, %cst_77 {dimension_numbers = #tpu.dot_dimension_numbers<[1], [0], [0], [1], [0, 0, 1, 1], [], []>} : vector<16x8xf32>, vector<8x64xf32>, vector<16x64xf32> -> vector<16x64xf32>
    %90 = arith.addf %83, %89 : vector<16x64xf32>
    %c0_78 = arith.constant 0 : index
    %c0_79 = arith.constant 0 : index
    %c0_80 = arith.constant 0 : index
    %91 = vector.load %arg6[%c0_78, %c0_79, %c0_80] : memref<1x16x1xf32, #tpu.memory_space<vmem>>, vector<1x16x1xf32>
    %92 = vector.shape_cast %91 : vector<1x16x1xf32> to vector<16x1xf32>
    %cst_81 = arith.constant dense<0.000000e+00> : vector<16xf32>
    %93 = vector.multi_reduction <add>, %90, %cst_81 [1] : vector<16x64xf32> to vector<16xf32>
    %94 = vector.shape_cast %93 : vector<16xf32> to vector<16x1xf32>
    %95 = arith.mulf %90, %90 : vector<16x64xf32>
    %cst_82 = arith.constant dense<0.000000e+00> : vector<16xf32>
    %96 = vector.multi_reduction <add>, %95, %cst_82 [1] : vector<16x64xf32> to vector<16xf32>
    %97 = vector.shape_cast %96 : vector<16xf32> to vector<16x1xf32>
    %cst_83 = arith.constant 1.562500e-02 : f32
    %98 = vector.broadcast %cst_83 : f32 to vector<16x1xf32>
    %99 = arith.mulf %94, %98 : vector<16x1xf32>
    %cst_84 = arith.constant 1.562500e-02 : f32
    %100 = vector.broadcast %cst_84 : f32 to vector<16x1xf32>
    %101 = arith.mulf %97, %100 : vector<16x1xf32>
    %102 = arith.mulf %99, %99 : vector<16x1xf32>
    %103 = arith.subf %101, %102 : vector<16x1xf32>
    %cst_85 = arith.constant 0.000000e+00 : f32
    %104 = vector.broadcast %cst_85 : f32 to vector<16x1xf32>
    %105 = arith.maximumf %103, %104 : vector<16x1xf32>
    %cst_86 = arith.constant 9.99999974E-6 : f32
    %106 = vector.broadcast %cst_86 : f32 to vector<16x1xf32>
    %107 = arith.addf %105, %106 : vector<16x1xf32>
    %108 = math.rsqrt %107 : vector<16x1xf32>
    %109 = arith.mulf %92, %108 : vector<16x1xf32>
    %110 = vector.broadcast %99 : vector<16x1xf32> to vector<16x64xf32>
    %111 = arith.subf %90, %110 : vector<16x64xf32>
    %112 = vector.broadcast %109 : vector<16x1xf32> to vector<16x64xf32>
    %113 = arith.mulf %111, %112 : vector<16x64xf32>
    %cst_87 = arith.constant 0.000000e+00 : f32
    %114 = vector.broadcast %cst_87 : f32 to vector<16x64xf32>
    %115 = arith.maximumf %113, %114 : vector<16x64xf32>
    %c0_88 = arith.constant 0 : index
    %c0_89 = arith.constant 0 : index
    %c0_90 = arith.constant 0 : index
    %116 = vector.load %arg7[%c0_88, %c0_89, %c0_90] : memref<9x64x16xf32, #tpu.memory_space<vmem>>, vector<1x64x16xf32>
    %117 = vector.shape_cast %116 : vector<1x64x16xf32> to vector<64x16xf32>
    %cst_91 = arith.constant dense<0.000000e+00> : vector<16x16xf32>
    %118 = tpu.matmul %115, %117, %cst_91 {dimension_numbers = #tpu.dot_dimension_numbers<[1], [0], [0], [1], [0, 0, 1, 1], [], []>} : vector<16x64xf32>, vector<64x16xf32>, vector<16x16xf32> -> vector<16x16xf32>
    %c0_92 = arith.constant 0 : index
    %c0_93 = arith.constant 0 : index
    %c0_94 = arith.constant 0 : index
    %119 = vector.load %arg8[%c0_92, %c0_93, %c0_94] : memref<9x32x16xf32, #tpu.memory_space<vmem>>, vector<1x32x16xf32>
    %120 = vector.shape_cast %119 : vector<1x32x16xf32> to vector<32x16xf32>
    %cst_95 = arith.constant dense<0.000000e+00> : vector<32x16xf32>
    %121 = tpu.matmul %120, %118, %cst_95 {dimension_numbers = #tpu.dot_dimension_numbers<[1], [0], [0], [1], [0, 0, 1, 1], [], []>} : vector<32x16xf32>, vector<16x16xf32>, vector<32x16xf32> -> vector<32x16xf32>
    %c1_96 = arith.constant 1 : index
    %c0_97 = arith.constant 0 : index
    %c0_98 = arith.constant 0 : index
    %122 = vector.load %arg7[%c1_96, %c0_97, %c0_98] : memref<9x64x16xf32, #tpu.memory_space<vmem>>, vector<1x64x16xf32>
    %123 = vector.shape_cast %122 : vector<1x64x16xf32> to vector<64x16xf32>
    %cst_99 = arith.constant dense<0.000000e+00> : vector<16x16xf32>
    %124 = tpu.matmul %115, %123, %cst_99 {dimension_numbers = #tpu.dot_dimension_numbers<[1], [0], [0], [1], [0, 0, 1, 1], [], []>} : vector<16x64xf32>, vector<64x16xf32>, vector<16x16xf32> -> vector<16x16xf32>
    %c1_100 = arith.constant 1 : index
    %c0_101 = arith.constant 0 : index
    %c0_102 = arith.constant 0 : index
    %125 = vector.load %arg8[%c1_100, %c0_101, %c0_102] : memref<9x32x16xf32, #tpu.memory_space<vmem>>, vector<1x32x16xf32>
    %126 = vector.shape_cast %125 : vector<1x32x16xf32> to vector<32x16xf32>
    %cst_103 = arith.constant dense<0.000000e+00> : vector<32x16xf32>
    %127 = tpu.matmul %126, %124, %cst_103 {dimension_numbers = #tpu.dot_dimension_numbers<[1], [0], [0], [1], [0, 0, 1, 1], [], []>} : vector<32x16xf32>, vector<16x16xf32>, vector<32x16xf32> -> vector<32x16xf32>
    %128 = arith.addf %121, %127 : vector<32x16xf32>
    %c2_104 = arith.constant 2 : index
    %c0_105 = arith.constant 0 : index
    %c0_106 = arith.constant 0 : index
    %129 = vector.load %arg7[%c2_104, %c0_105, %c0_106] : memref<9x64x16xf32, #tpu.memory_space<vmem>>, vector<1x64x16xf32>
    %130 = vector.shape_cast %129 : vector<1x64x16xf32> to vector<64x16xf32>
    %cst_107 = arith.constant dense<0.000000e+00> : vector<16x16xf32>
    %131 = tpu.matmul %115, %130, %cst_107 {dimension_numbers = #tpu.dot_dimension_numbers<[1], [0], [0], [1], [0, 0, 1, 1], [], []>} : vector<16x64xf32>, vector<64x16xf32>, vector<16x16xf32> -> vector<16x16xf32>
    %c2_108 = arith.constant 2 : index
    %c0_109 = arith.constant 0 : index
    %c0_110 = arith.constant 0 : index
    %132 = vector.load %arg8[%c2_108, %c0_109, %c0_110] : memref<9x32x16xf32, #tpu.memory_space<vmem>>, vector<1x32x16xf32>
    %133 = vector.shape_cast %132 : vector<1x32x16xf32> to vector<32x16xf32>
    %cst_111 = arith.constant dense<0.000000e+00> : vector<32x16xf32>
    %134 = tpu.matmul %133, %131, %cst_111 {dimension_numbers = #tpu.dot_dimension_numbers<[1], [0], [0], [1], [0, 0, 1, 1], [], []>} : vector<32x16xf32>, vector<16x16xf32>, vector<32x16xf32> -> vector<32x16xf32>
    %135 = arith.addf %128, %134 : vector<32x16xf32>
    %c3_112 = arith.constant 3 : index
    %c0_113 = arith.constant 0 : index
    %c0_114 = arith.constant 0 : index
    %136 = vector.load %arg7[%c3_112, %c0_113, %c0_114] : memref<9x64x16xf32, #tpu.memory_space<vmem>>, vector<1x64x16xf32>
    %137 = vector.shape_cast %136 : vector<1x64x16xf32> to vector<64x16xf32>
    %cst_115 = arith.constant dense<0.000000e+00> : vector<16x16xf32>
    %138 = tpu.matmul %115, %137, %cst_115 {dimension_numbers = #tpu.dot_dimension_numbers<[1], [0], [0], [1], [0, 0, 1, 1], [], []>} : vector<16x64xf32>, vector<64x16xf32>, vector<16x16xf32> -> vector<16x16xf32>
    %c3_116 = arith.constant 3 : index
    %c0_117 = arith.constant 0 : index
    %c0_118 = arith.constant 0 : index
    %139 = vector.load %arg8[%c3_116, %c0_117, %c0_118] : memref<9x32x16xf32, #tpu.memory_space<vmem>>, vector<1x32x16xf32>
    %140 = vector.shape_cast %139 : vector<1x32x16xf32> to vector<32x16xf32>
    %cst_119 = arith.constant dense<0.000000e+00> : vector<32x16xf32>
    %141 = tpu.matmul %140, %138, %cst_119 {dimension_numbers = #tpu.dot_dimension_numbers<[1], [0], [0], [1], [0, 0, 1, 1], [], []>} : vector<32x16xf32>, vector<16x16xf32>, vector<32x16xf32> -> vector<32x16xf32>
    %142 = arith.addf %135, %141 : vector<32x16xf32>
    %c4_120 = arith.constant 4 : index
    %c0_121 = arith.constant 0 : index
    %c0_122 = arith.constant 0 : index
    %143 = vector.load %arg7[%c4_120, %c0_121, %c0_122] : memref<9x64x16xf32, #tpu.memory_space<vmem>>, vector<1x64x16xf32>
    %144 = vector.shape_cast %143 : vector<1x64x16xf32> to vector<64x16xf32>
    %cst_123 = arith.constant dense<0.000000e+00> : vector<16x16xf32>
    %145 = tpu.matmul %115, %144, %cst_123 {dimension_numbers = #tpu.dot_dimension_numbers<[1], [0], [0], [1], [0, 0, 1, 1], [], []>} : vector<16x64xf32>, vector<64x16xf32>, vector<16x16xf32> -> vector<16x16xf32>
    %c4_124 = arith.constant 4 : index
    %c0_125 = arith.constant 0 : index
    %c0_126 = arith.constant 0 : index
    %146 = vector.load %arg8[%c4_124, %c0_125, %c0_126] : memref<9x32x16xf32, #tpu.memory_space<vmem>>, vector<1x32x16xf32>
    %147 = vector.shape_cast %146 : vector<1x32x16xf32> to vector<32x16xf32>
    %cst_127 = arith.constant dense<0.000000e+00> : vector<32x16xf32>
    %148 = tpu.matmul %147, %145, %cst_127 {dimension_numbers = #tpu.dot_dimension_numbers<[1], [0], [0], [1], [0, 0, 1, 1], [], []>} : vector<32x16xf32>, vector<16x16xf32>, vector<32x16xf32> -> vector<32x16xf32>
    %149 = arith.addf %142, %148 : vector<32x16xf32>
    %c5_128 = arith.constant 5 : index
    %c0_129 = arith.constant 0 : index
    %c0_130 = arith.constant 0 : index
    %150 = vector.load %arg7[%c5_128, %c0_129, %c0_130] : memref<9x64x16xf32, #tpu.memory_space<vmem>>, vector<1x64x16xf32>
    %151 = vector.shape_cast %150 : vector<1x64x16xf32> to vector<64x16xf32>
    %cst_131 = arith.constant dense<0.000000e+00> : vector<16x16xf32>
    %152 = tpu.matmul %115, %151, %cst_131 {dimension_numbers = #tpu.dot_dimension_numbers<[1], [0], [0], [1], [0, 0, 1, 1], [], []>} : vector<16x64xf32>, vector<64x16xf32>, vector<16x16xf32> -> vector<16x16xf32>
    %c5_132 = arith.constant 5 : index
    %c0_133 = arith.constant 0 : index
    %c0_134 = arith.constant 0 : index
    %153 = vector.load %arg8[%c5_132, %c0_133, %c0_134] : memref<9x32x16xf32, #tpu.memory_space<vmem>>, vector<1x32x16xf32>
    %154 = vector.shape_cast %153 : vector<1x32x16xf32> to vector<32x16xf32>
    %cst_135 = arith.constant dense<0.000000e+00> : vector<32x16xf32>
    %155 = tpu.matmul %154, %152, %cst_135 {dimension_numbers = #tpu.dot_dimension_numbers<[1], [0], [0], [1], [0, 0, 1, 1], [], []>} : vector<32x16xf32>, vector<16x16xf32>, vector<32x16xf32> -> vector<32x16xf32>
    %156 = arith.addf %149, %155 : vector<32x16xf32>
    %c6_136 = arith.constant 6 : index
    %c0_137 = arith.constant 0 : index
    %c0_138 = arith.constant 0 : index
    %157 = vector.load %arg7[%c6_136, %c0_137, %c0_138] : memref<9x64x16xf32, #tpu.memory_space<vmem>>, vector<1x64x16xf32>
    %158 = vector.shape_cast %157 : vector<1x64x16xf32> to vector<64x16xf32>
    %cst_139 = arith.constant dense<0.000000e+00> : vector<16x16xf32>
    %159 = tpu.matmul %115, %158, %cst_139 {dimension_numbers = #tpu.dot_dimension_numbers<[1], [0], [0], [1], [0, 0, 1, 1], [], []>} : vector<16x64xf32>, vector<64x16xf32>, vector<16x16xf32> -> vector<16x16xf32>
    %c6_140 = arith.constant 6 : index
    %c0_141 = arith.constant 0 : index
    %c0_142 = arith.constant 0 : index
    %160 = vector.load %arg8[%c6_140, %c0_141, %c0_142] : memref<9x32x16xf32, #tpu.memory_space<vmem>>, vector<1x32x16xf32>
    %161 = vector.shape_cast %160 : vector<1x32x16xf32> to vector<32x16xf32>
    %cst_143 = arith.constant dense<0.000000e+00> : vector<32x16xf32>
    %162 = tpu.matmul %161, %159, %cst_143 {dimension_numbers = #tpu.dot_dimension_numbers<[1], [0], [0], [1], [0, 0, 1, 1], [], []>} : vector<32x16xf32>, vector<16x16xf32>, vector<32x16xf32> -> vector<32x16xf32>
    %163 = arith.addf %156, %162 : vector<32x16xf32>
    %c7_144 = arith.constant 7 : index
    %c0_145 = arith.constant 0 : index
    %c0_146 = arith.constant 0 : index
    %164 = vector.load %arg7[%c7_144, %c0_145, %c0_146] : memref<9x64x16xf32, #tpu.memory_space<vmem>>, vector<1x64x16xf32>
    %165 = vector.shape_cast %164 : vector<1x64x16xf32> to vector<64x16xf32>
    %cst_147 = arith.constant dense<0.000000e+00> : vector<16x16xf32>
    %166 = tpu.matmul %115, %165, %cst_147 {dimension_numbers = #tpu.dot_dimension_numbers<[1], [0], [0], [1], [0, 0, 1, 1], [], []>} : vector<16x64xf32>, vector<64x16xf32>, vector<16x16xf32> -> vector<16x16xf32>
    %c7_148 = arith.constant 7 : index
    %c0_149 = arith.constant 0 : index
    %c0_150 = arith.constant 0 : index
    %167 = vector.load %arg8[%c7_148, %c0_149, %c0_150] : memref<9x32x16xf32, #tpu.memory_space<vmem>>, vector<1x32x16xf32>
    %168 = vector.shape_cast %167 : vector<1x32x16xf32> to vector<32x16xf32>
    %cst_151 = arith.constant dense<0.000000e+00> : vector<32x16xf32>
    %169 = tpu.matmul %168, %166, %cst_151 {dimension_numbers = #tpu.dot_dimension_numbers<[1], [0], [0], [1], [0, 0, 1, 1], [], []>} : vector<32x16xf32>, vector<16x16xf32>, vector<32x16xf32> -> vector<32x16xf32>
    %170 = arith.addf %163, %169 : vector<32x16xf32>
    %c8_152 = arith.constant 8 : index
    %c0_153 = arith.constant 0 : index
    %c0_154 = arith.constant 0 : index
    %171 = vector.load %arg7[%c8_152, %c0_153, %c0_154] : memref<9x64x16xf32, #tpu.memory_space<vmem>>, vector<1x64x16xf32>
    %172 = vector.shape_cast %171 : vector<1x64x16xf32> to vector<64x16xf32>
    %cst_155 = arith.constant dense<0.000000e+00> : vector<16x16xf32>
    %173 = tpu.matmul %115, %172, %cst_155 {dimension_numbers = #tpu.dot_dimension_numbers<[1], [0], [0], [1], [0, 0, 1, 1], [], []>} : vector<16x64xf32>, vector<64x16xf32>, vector<16x16xf32> -> vector<16x16xf32>
    %c8_156 = arith.constant 8 : index
    %c0_157 = arith.constant 0 : index
    %c0_158 = arith.constant 0 : index
    %174 = vector.load %arg8[%c8_156, %c0_157, %c0_158] : memref<9x32x16xf32, #tpu.memory_space<vmem>>, vector<1x32x16xf32>
    %175 = vector.shape_cast %174 : vector<1x32x16xf32> to vector<32x16xf32>
    %cst_159 = arith.constant dense<0.000000e+00> : vector<32x16xf32>
    %176 = tpu.matmul %175, %173, %cst_159 {dimension_numbers = #tpu.dot_dimension_numbers<[1], [0], [0], [1], [0, 0, 1, 1], [], []>} : vector<32x16xf32>, vector<16x16xf32>, vector<32x16xf32> -> vector<32x16xf32>
    %177 = arith.addf %170, %176 : vector<32x16xf32>
    %c0_160 = arith.constant 0 : index
    %c0_161 = arith.constant 0 : index
    %c0_162 = arith.constant 0 : index
    %178 = vector.load %arg9[%c0_160, %c0_161, %c0_162] : memref<1x32x1xf32, #tpu.memory_space<vmem>>, vector<1x32x1xf32>
    %179 = vector.shape_cast %178 : vector<1x32x1xf32> to vector<32x1xf32>
    %cst_163 = arith.constant dense<0.000000e+00> : vector<32xf32>
    %180 = vector.multi_reduction <add>, %177, %cst_163 [1] : vector<32x16xf32> to vector<32xf32>
    %181 = vector.shape_cast %180 : vector<32xf32> to vector<32x1xf32>
    %182 = arith.mulf %177, %177 : vector<32x16xf32>
    %cst_164 = arith.constant dense<0.000000e+00> : vector<32xf32>
    %183 = vector.multi_reduction <add>, %182, %cst_164 [1] : vector<32x16xf32> to vector<32xf32>
    %184 = vector.shape_cast %183 : vector<32xf32> to vector<32x1xf32>
    %cst_165 = arith.constant 6.250000e-02 : f32
    %185 = vector.broadcast %cst_165 : f32 to vector<32x1xf32>
    %186 = arith.mulf %181, %185 : vector<32x1xf32>
    %cst_166 = arith.constant 6.250000e-02 : f32
    %187 = vector.broadcast %cst_166 : f32 to vector<32x1xf32>
    %188 = arith.mulf %184, %187 : vector<32x1xf32>
    %189 = arith.mulf %186, %186 : vector<32x1xf32>
    %190 = arith.subf %188, %189 : vector<32x1xf32>
    %cst_167 = arith.constant 0.000000e+00 : f32
    %191 = vector.broadcast %cst_167 : f32 to vector<32x1xf32>
    %192 = arith.maximumf %190, %191 : vector<32x1xf32>
    %cst_168 = arith.constant 9.99999974E-6 : f32
    %193 = vector.broadcast %cst_168 : f32 to vector<32x1xf32>
    %194 = arith.addf %192, %193 : vector<32x1xf32>
    %195 = math.rsqrt %194 : vector<32x1xf32>
    %196 = arith.mulf %179, %195 : vector<32x1xf32>
    %197 = vector.broadcast %186 : vector<32x1xf32> to vector<32x16xf32>
    %198 = arith.subf %177, %197 : vector<32x16xf32>
    %199 = vector.broadcast %196 : vector<32x1xf32> to vector<32x16xf32>
    %200 = arith.mulf %198, %199 : vector<32x16xf32>
    %cst_169 = arith.constant 0.000000e+00 : f32
    %201 = vector.broadcast %cst_169 : f32 to vector<32x16xf32>
    %202 = arith.maximumf %200, %201 : vector<32x16xf32>
    %c0_170 = arith.constant 0 : index
    %c0_171 = arith.constant 0 : index
    %c0_172 = arith.constant 0 : index
    %203 = vector.load %arg10[%c0_170, %c0_171, %c0_172] : memref<1x32x16xf32, #tpu.memory_space<vmem>>, vector<1x32x16xf32>
    %204 = vector.shape_cast %203 : vector<1x32x16xf32> to vector<32x16xf32>
    %205 = vector.shape_cast %202 : vector<32x16xf32> to vector<1x32x16xf32>
    tpu.vector_store %arg10[%c0_170, %c0_171, %c0_172], %205 {strides = array<i32>} : memref<1x32x16xf32, #tpu.memory_space<vmem>>, vector<1x32x16xf32>,
    return
  }
  func.func @transform_0(%arg0: i32) -> (i32, i32, i32) {
    %c0_i32 = arith.constant 0 : i32
    %c0_i32_0 = arith.constant 0 : i32
    %c0_i32_1 = arith.constant 0 : i32
    return %arg0, %c0_i32, %c0_i32_0 : i32, i32, i32
  }
  func.func @transform_1(%arg0: i32) -> (i32, i32) {
    %c0_i32 = arith.constant 0 : i32
    %c0_i32_0 = arith.constant 0 : i32
    %c0_i32_1 = arith.constant 0 : i32
    return %c0_i32, %c0_i32_0 : i32, i32
  }
  func.func @transform_2(%arg0: i32) -> (i32, i32, i32) {
    %c0_i32 = arith.constant 0 : i32
    %c0_i32_0 = arith.constant 0 : i32
    %c0_i32_1 = arith.constant 0 : i32
    return %arg0, %c0_i32, %c0_i32_0 : i32, i32, i32
  }
  func.func @transform_3(%arg0: i32) -> (i32, i32, i32) {
    %c0_i32 = arith.constant 0 : i32
    %c0_i32_0 = arith.constant 0 : i32
    %c0_i32_1 = arith.constant 0 : i32
    %c0_i32_2 = arith.constant 0 : i32
    return %c0_i32, %c0_i32_0, %c0_i32_1 : i32, i32, i32
  }
  func.func @transform_4(%arg0: i32) -> (i32, i32, i32) {
    %c0_i32 = arith.constant 0 : i32
    %c0_i32_0 = arith.constant 0 : i32
    %c0_i32_1 = arith.constant 0 : i32
    %c0_i32_2 = arith.constant 0 : i32
    return %c0_i32, %c0_i32_0, %c0_i32_1 : i32, i32, i32
  }
  func.func @transform_5(%arg0: i32) -> (i32, i32, i32) {
    %c0_i32 = arith.constant 0 : i32
    %c0_i32_0 = arith.constant 0 : i32
    %c0_i32_1 = arith.constant 0 : i32
    return %arg0, %c0_i32, %c0_i32_0 : i32, i32, i32
  }
  func.func @transform_6(%arg0: i32) -> (i32, i32, i32) {
    %c0_i32 = arith.constant 0 : i32
    %c0_i32_0 = arith.constant 0 : i32
    %c0_i32_1 = arith.constant 0 : i32
    %c0_i32_2 = arith.constant 0 : i32
    return %c0_i32, %c0_i32_0, %c0_i32_1 : i32, i32, i32
  }
  func.func @transform_7(%arg0: i32) -> (i32, i32, i32) {
    %c0_i32 = arith.constant 0 : i32
    %c0_i32_0 = arith.constant 0 : i32
    %c0_i32_1 = arith.constant 0 : i32
    %c0_i32_2 = arith.constant 0 : i32
    return %c0_i32, %c0_i32_0, %c0_i32_1 : i32, i32, i32
  }
  func.func @transform_8(%arg0: i32) -> (i32, i32, i32) {
    %c0_i32 = arith.constant 0 : i32
    %c0_i32_0 = arith.constant 0 : i32
    %c0_i32_1 = arith.constant 0 : i32
    return %arg0, %c0_i32, %c0_i32_0 : i32, i32, i32
  }
  func.func @transform_9(%arg0: i32) -> (i32, i32, i32) {
    %c0_i32 = arith.constant 0 : i32
    %c0_i32_0 = arith.constant 0 : i32
    %c0_i32_1 = arith.constant 0 : i32
    return %arg0, %c0_i32, %c0_i32_0 : i32, i32, i32
  }
}

</mosaic_0001>

<bundles_post_ra>
// kernel: cres_encoder_forward.1
= control target key start
LH: loop header
LB: loop body
LE: loop exit
PB: predicated region body
PF: predicated region fallthrough
CT: control target
= control target key end

     0   :  { %s5624_s30 = smov 0   ;;  %s7139_s0 = inlined_call_operand.vmem [shape: bf16[2,160,256], index: 0, kind: input, shape index: {}]   ;;  %s7140_s1 = inlined_call_operand.vmem [shape: bf16[8,160], index: 1, kind: input, shape index: {}]   ;;  %s7141_s2 = inlined_call_operand.vmem [shape: f32[2,8,1], index: 2, kind: input, shape index: {}]   ;;  %s7142_s3 = inlined_call_operand.vmem [shape: f32[9,256,64], index: 3, kind: input, shape index: {}]   ;;  %s7143_s4 = inlined_call_operand.vmem [shape: f32[9,16,8], index: 4, kind: input, shape index: {}]   ;;  %s7144_s5 = inlined_call_operand.vmem [shape: f32[2,16,1], index: 5, kind: input, shape index: {}]   ;;  %s7145_s6 = inlined_call_operand.vmem [shape: f32[9,64,16], index: 6, kind: input, shape index: {}]   ;;  %s7146_s7 = inlined_call_operand.vmem [shape: f32[9,32,16], index: 7, kind: input, shape index: {}]   ;;  %s7147_s8 = inlined_call_operand.vmem [shape: f32[2,32,1], index: 8, kind: input, shape index: {}]   ;;  %s7148_s9 = inlined_call_operand.vmem [shape: f32[2,32,16], index: 9, kind: output, shape index: {}]  }
   0x1 LB: > { %s4234_s10 = sadd.s32 4294967295, %s5571_s30   ;;  %p4238_p0 = scmp.ge.s32.totalorder %s5571_s30, 1  ;;  %s5571_s30 = sphi %s5624_s30, %s19_s30  }
   0x2   : > { %p316_p1 = scmp.lt.s32.totalorder %s5571_s30, 3 }
   0x4   : > { %p317_p2 = pnand %p4238_p0, %p316_p1 }
   0x5   : > { %p366_p3 = scmp.lt.s32.totalorder (!%p317_p2), %s4234_s10, 1 }
   0x6   : > { %320 = sbr.rel (%p317_p2) target bundleno = 5095 (0x13e7), region = 56 }
   0xb   : > { %v391_v0 = vld [vmem:[%s7140_s1] sm:$0xff]  ;;  %vm518_vm0 = vcmask 261120   ;;  %s7150_s10 = smov (!%p366_p3, %s4234_s10), 1  ;;  %v5573_v31 = vmov 0   ;;  %v622_v32 = vld [vmem:[%s7142_s3 + $0xf8] sm:$0xff]  ;;  %v621_v34 = vld [vmem:[%s7142_s3 + $0xf0] sm:$0xff] }
   0xc   : > { %v4248_v1 = vcombine.high %v391_v0, %v391_v0  ;;  %s5507_s13 = smul.u32 160, %s7150_s10  ;;  %v4247_v22 = vcombine.low %v391_v0, %v391_v0  ;;  %5517 = vset.pattern.permute.xlu1 %v5573_v31  ;;  %5518 = vset.pattern.permute.xlu0 %v5573_v31  ;;  %v606_v33 = vld [vmem:[%s7142_s3 + $0x78] sm:$0xff]  ;;  %v605_v35 = vld [vmem:[%s7142_s3 + $0x70] sm:$0xff]  ;;  %v620_v36 = vld [vmem:[%s7142_s3 + $0xe8] sm:$0xff]  ;;  %vm801_vm1 = vcmask 64512   ;;  %vm2289_vm2 = vcmask 523264  }
   0xd   : > { %4715 = vmatprep.subr.mxu1 %v622_v32  ;;  %v604_v37 = vld [vmem:[%s7142_s3 + $0x68] sm:$0xff]  ;;  %v619_v38 = vld [vmem:[%s7142_s3 + $0xe0] sm:$0xff]  ;;  %v618_v40 = vld [vmem:[%s7142_s3 + $0xd8] sm:$0xff]  ;;  %s4712_s22 = sshll.u32 %s7150_s10, 4  ;;  %vm2518_vm3 = vcmask 130048   ;;  %s4713_s17 = sshll.u32 %s7150_s10, 5 }
   0xe   : > { %4269 = vmatprep.mubr.msk.bf16.mxu0 %vm518_vm0, %v4248_v1  ;;  %s5641_s16 = scalar_lea.vmem %s7139_s0, %s5507_s13  ;;  %4716 = vmatpush3.msra.mxu1 %v606_v33  ;;  %v603_v39 = vld [vmem:[%s7142_s3 + $0x60] sm:$0xff]  ;;  %v602_v41 = vld [vmem:[%s7142_s3 + $0x58] sm:$0xff]  ;;  %v617_v42 = vld [vmem:[%s7142_s3 + $0xd0] sm:$0xff]  ;;  %s379_s25 = scalar_lea.vmem %s7144_s5, %s4712_s22 }
   0xf   : > { %v5519_v2 = vld [vmem:[%s5641_s16 + $0x74] ss:$8 sps:$4 sm:$0xff]   ;;  %v5521_v3 = vld [vmem:[%s5641_s16 + $0x70] ss:$8 sps:$4 sm:$0xff]   ;;  %v5522_v4 = vld [vmem:[%s5641_s16 + $0x64] ss:$8 sps:$4 sm:$0xff]   ;;  %4717 = vmatprep.subr.mxu1 %v621_v34  ;;  %s384_s20 = scalar_lea.vmem %s7147_s8, %s4713_s17  ;;  %s389_s22 = scalar_lea.vmem %s7148_s9, %s4713_s17 }
  0x10   : > { %522 = vmatprep.subr.bf16.mxu0 %v5519_v2  ;;  %v5524_v5 = vld [vmem:[%s5641_s16 + $0x60] ss:$8 sps:$4 sm:$0xff]   ;;  %v5525_v6 = vld [vmem:[%s5641_s16 + $0x54] ss:$8 sps:$4 sm:$0xff]   ;;  %v5527_v7 = vld [vmem:[%s5641_s16 + $0x50] ss:$8 sps:$4 sm:$0xff]   ;;  %4718 = vmatpush3.msra.mxu1 %v605_v35 }
  0x11   : > { %523 = vmatpush1.bf16.msra.mxu0 %v5521_v3  ;;  %v5528_v8 = vld [vmem:[%s5641_s16 + $0x44] ss:$8 sps:$4 sm:$0xff]   ;;  %v5530_v9 = vld [vmem:[%s5641_s16 + $0x40] ss:$8 sps:$4 sm:$0xff]   ;;  %v5531_v10 = vld [vmem:[%s5641_s16 + $0x34] ss:$8 sps:$4 sm:$0xff]   ;;  %4719 = vmatprep.subr.mxu1 %v620_v36 }
  0x12   : > { %524 = vmatprep.subr.bf16.mxu0 %v5522_v4  ;;  %v5533_v11 = vld [vmem:[%s5641_s16 + $0x30] ss:$8 sps:$4 sm:$0xff]   ;;  %v5534_v12 = vld [vmem:[%s5641_s16 + $0x24] ss:$8 sps:$4 sm:$0xff]   ;;  %v5536_v13 = vld [vmem:[%s5641_s16 + $0x20] ss:$8 sps:$4 sm:$0xff]   ;;  %4720 = vmatpush3.msra.mxu1 %v604_v37 }
  0x13   : > { %v5537_v14 = vld [vmem:[%s5641_s16 + $0x14] ss:$8 sps:$4 sm:$0xff]   ;;  %v5539_v15 = vld [vmem:[%s5641_s16 + $0x10] ss:$8 sps:$4 sm:$0xff]   ;;  %v5540_v16 = vld [vmem:[%s5641_s16 + $0x4] ss:$8 sps:$4 sm:$0xff]   ;;  %4721 = vmatprep.subr.mxu1 %v619_v38 }
  0x14   : > { %v5542_v17 = vld [vmem:[%s5641_s16] ss:$8 sps:$4 sm:$0xff]   ;;  %v5543_v18 = vld [vmem:[%s5641_s16 + $0x94] ss:$8 sps:$4 sm:$0xff]   ;;  %v5545_v19 = vld [vmem:[%s5641_s16 + $0x90] ss:$8 sps:$4 sm:$0xff]   ;;  %4722 = vmatpush3.msra.mxu1 %v603_v39 }
  0x15   : > { %525 = vmatpush1.bf16.msra.mxu0 %v5524_v5  ;;  %v5546_v20 = vld [vmem:[%s5641_s16 + $0x84] ss:$8 sps:$4 sm:$0xff]   ;;  %v5548_v21 = vld [vmem:[%s5641_s16 + $0x80] ss:$8 sps:$4 sm:$0xff]   ;;  %4723 = vmatprep.subr.mxu1 %v618_v40  ;;  %v601_v43 = vld [vmem:[%s7142_s3 + $0x50] sm:$0xff]  ;;  %s4240_s16 = sshll.u32 %s7150_s10, 3 }
  0x16   : > { %526 = vmatprep.subr.bf16.mxu0 %v5525_v6  ;;  %4724 = vmatpush3.msra.mxu1 %v602_v41  ;;  %v616_v44 = vld [vmem:[%s7142_s3 + $0xc8] sm:$0xff]  ;;  %v615_v46 = vld [vmem:[%s7142_s3 + $0xc0] sm:$0xff]  ;;  %v614_v48 = vld [vmem:[%s7142_s3 + $0xb8] sm:$0xff]  ;;  %s374_s19 = scalar_lea.vmem %s7141_s2, %s4240_s16 }
  0x17   : > { %4725 = vmatprep.subr.mxu1 %v617_v42  ;;  %v600_v45 = vld [vmem:[%s7142_s3 + $0x48] sm:$0xff]  ;;  %v599_v47 = vld [vmem:[%s7142_s3 + $0x40] sm:$0xff]  ;;  %v598_v49 = vld [vmem:[%s7142_s3 + $0x38] sm:$0xff] }
  0x18   : > { %4726 = vmatpush3.msra.mxu1 %v601_v43  ;;  %v613_v50 = vld [vmem:[%s7142_s3 + $0xb0] sm:$0xff]  ;;  %v612_v52 = vld [vmem:[%s7142_s3 + $0xa8] sm:$0xff]  ;;  %v611_v54 = vld [vmem:[%s7142_s3 + $0xa0] sm:$0xff] }
  0x19   : > { %527 = vmatpush1.bf16.msra.mxu0 %v5527_v7  ;;  %4727 = vmatprep.subr.mxu1 %v616_v44  ;;  %v597_v51 = vld [vmem:[%s7142_s3 + $0x30] sm:$0xff]  ;;  %v596_v53 = vld [vmem:[%s7142_s3 + $0x28] sm:$0xff]  ;;  %v595_v55 = vld [vmem:[%s7142_s3 + $0x20] sm:$0xff] }
  0x1a   : > { %528 = vmatprep.subr.bf16.mxu0 %v5528_v8  ;;  %4728 = vmatpush3.msra.mxu1 %v600_v45  ;;  %v610_v56 = vld [vmem:[%s7142_s3 + $0x98] sm:$0xff]  ;;  %v609_v58 = vld [vmem:[%s7142_s3 + $0x90] sm:$0xff]  ;;  %v563_v4 = vld [vmem:[%s374_s19] sm:$0xff] }
  0x1b   : > { %4729 = vmatprep.subr.mxu1 %v615_v46  ;;  %v594_v57 = vld [vmem:[%s7142_s3 + $0x18] sm:$0xff]  ;;  %v593_v59 = vld [vmem:[%s7142_s3 + $0x10] sm:$0xff]  ;;  %v608_v5 = vld [vmem:[%s7142_s3 + $0x88] sm:$0xff] }
  0x1c   : > { %4730 = vmatpush3.msra.mxu1 %v599_v47  ;;  %v592_v6 = vld [vmem:[%s7142_s3 + $0x8] sm:$0xff]  ;;  %v607_v8 = vld [vmem:[%s7142_s3 + $0x80] sm:$0xff]  ;;  %v4293_v34 = vld [vmem:[%s7142_s3 + $0x1b8] sm:$0xff] }
  0x1d   : > { %529 = vmatpush1.bf16.msra.mxu0 %v5530_v9  ;;  %4731 = vmatprep.subr.mxu1 %v614_v48  ;;  %v4279_v31 = vld [vmem:[%s7142_s3 + $0x148] sm:$0xff]  ;;  %v4294_v32 = vld [vmem:[%s7142_s3 + $0x1c0] sm:$0xff]  ;;  %v4277_v35 = vld [vmem:[%s7142_s3 + $0x138] sm:$0xff] }
  0x1e   : > { %530 = vmatprep.subr.bf16.mxu0 %v5531_v10  ;;  %4732 = vmatpush3.msra.mxu1 %v598_v49  ;;  %v591_v10 = vld [vmem:[%s7142_s3] sm:$0xff]  ;;  %v4292_v36 = vld [vmem:[%s7142_s3 + $0x1b0] sm:$0xff]  ;;  %v4291_v38 = vld [vmem:[%s7142_s3 + $0x1a8] sm:$0xff] }
  0x1f   : > { %4733 = vmatprep.subr.mxu1 %v613_v50  ;;  %v4278_v33 = vld [vmem:[%s7142_s3 + $0x140] sm:$0xff]  ;;  %v4276_v37 = vld [vmem:[%s7142_s3 + $0x130] sm:$0xff]  ;;  %v4275_v39 = vld [vmem:[%s7142_s3 + $0x128] sm:$0xff] }
  0x20   : > { %4734 = vmatpush3.msra.mxu1 %v597_v51  ;;  %v4290_v40 = vld [vmem:[%s7142_s3 + $0x1a0] sm:$0xff]  ;;  %v4289_v42 = vld [vmem:[%s7142_s3 + $0x198] sm:$0xff]  ;;  %v4288_v44 = vld [vmem:[%s7142_s3 + $0x190] sm:$0xff] }
  0x21   : > { %531 = vmatpush1.bf16.msra.mxu0 %v5533_v11  ;;  %4735 = vmatprep.subr.mxu1 %v612_v52  ;;  %v4301_v11 = vld [vmem:[%s7142_s3 + $0x1f8] sm:$0xff]  ;;  %v4274_v41 = vld [vmem:[%s7142_s3 + $0x120] sm:$0xff]  ;;  %v4272_v45 = vld [vmem:[%s7142_s3 + $0x110] sm:$0xff] }
  0x22   : > { %532 = vmatprep.subr.bf16.mxu0 %v5534_v12  ;;  %4736 = vmatpush3.msra.mxu1 %v596_v53  ;;  %v4273_v43 = vld [vmem:[%s7142_s3 + $0x118] sm:$0xff]  ;;  %v4287_v46 = vld [vmem:[%s7142_s3 + $0x188] sm:$0xff]  ;;  %v4286_v48 = vld [vmem:[%s7142_s3 + $0x180] sm:$0xff] }
  0x23   : > { %4737 = vmatprep.subr.mxu1 %v611_v54  ;;  %v4271_v47 = vld [vmem:[%s7142_s3 + $0x108] sm:$0xff]  ;;  %v4270_v49 = vld [vmem:[%s7142_s3 + $0x100] sm:$0xff]  ;;  %v4302_v50 = vld [vmem:[%s7143_s4 + $0x10] sm:$0xff] }
  0x24   : > { %4738 = vmatpush3.msra.mxu1 %v595_v55 }
  0x25   : > { %533 = vmatpush1.bf16.msra.mxu0 %v5536_v13  ;;  %4739 = vmatprep.subr.mxu1 %v610_v56  ;;  %v4303_v56 = vld [vmem:[%s7143_s4 + $0x18] sm:$0xff] }
  0x26   : > { %534 = vmatprep.subr.bf16.mxu0 %v5537_v14  ;;  %4740 = vmatpush3.msra.mxu1 %v594_v57 }
  0x27   : > { %4741 = vmatprep.subr.mxu1 %v609_v58  ;;  %v693_v58 = vld [vmem:[%s7143_s4] sm:$0xff] }
  0x28   : > { %4742 = vmatpush3.msra.mxu1 %v593_v59  ;;  %v4339_v59 = vld [vmem:[%s7142_s3 + $0x2f8] sm:$0xff] }
  0x29   : > { %535 = vmatpush1.bf16.msra.mxu0 %v5539_v15  ;;  %4743 = vmatprep.subr.mxu1 %v608_v5  ;;  %v4319_v5 = vld [vmem:[%s7142_s3 + $0x258] sm:$0xff] }
  0x2a   : > { %536 = vmatprep.subr.bf16.mxu0 %v5540_v16  ;;  %4744 = vmatpush3.msra.mxu1 %v592_v6  ;;  %v4334_v6 = vld [vmem:[%s7142_s3 + $0x2d0] sm:$0xff] }
  0x2b   : > { %4745 = vmatprep.subr.mxu1 %v607_v8  ;;  %v4333_v8 = vld [vmem:[%s7142_s3 + $0x2c8] sm:$0xff] }
  0x2c   : > { %4746 = vmatpush3.msra.mxu1 %v591_v10  ;;  %v4332_v10 = vld [vmem:[%s7142_s3 + $0x2c0] sm:$0xff] }
  0x2d   : > { %537 = vmatpush1.bf16.msra.mxu0 %v5542_v17  ;;  %4750 = vmatprep.subr.mxu1 %v4301_v11  ;;  %v4316_v11 = vld [vmem:[%s7142_s3 + $0x240] sm:$0xff] }
  0x2e   : > { %550 = vmatprep.subr.bf16.mxu0 %v5543_v18 }
  0x31   : > { %551 = vmatpush2.bf16.msra.mxu0 %v5545_v19  ;;  %v4285_v19 = vld [vmem:[%s7142_s3 + $0x178] sm:$0xff] }
  0x32   : > { %552 = vmatprep.subr.bf16.mxu0 %v5546_v20  ;;  %v4300_v20 = vld [vmem:[%s7142_s3 + $0x1f0] sm:$0xff] }
  0x35   : > { %553 = vmatpush2.bf16.msra.mxu0 %v5548_v21  ;;  %v4284_v21 = vld [vmem:[%s7142_s3 + $0x170] sm:$0xff] }
  0x38   : > { %555 = vmatmul.mubr.bf16.vlgmr.msra.gmra.mxu0 %v4247_v22  ;;  %v4299_v22 = vld [vmem:[%s7142_s3 + $0x1e8] sm:$0xff] }
  0x39   : > { %5203 = vmatprep.mubr.msk.f32.mxu0 %vm801_vm1, %v4302_v50  ;;  %v4355_v50 = vld [vmem:[%s7142_s3 + $0x358] sm:$0xff] }
  0xf8   : > { %v5663_v23 = vpop.f32.mrf.mxu0 }
  0xf9   : > { %v567_v28 = vmul.f32 %v5663_v23, %v5663_v23 }
  0xfa   : > { %v5665_v24 = vpop.f32.mrf.mxu0 }
  0xfb   : > { %v564_v25 = vadd.f32 %v5665_v24, %v5663_v23  ;;  %v568_v26 = vmul.f32 %v5665_v24, %v5665_v24 }
  0xfc   : > { %v560_v27 = vpop.f32.mrf.mxu0 }
  0xfd   : > { %565 = vadd.xlane.f32.xlu0 %v564_v25  ;;  %v569_v30 = vadd.f32 %v568_v26, %v567_v28  ;;  %v4282_v25 = vld [vmem:[%s7142_s3 + $0x160] sm:$0xff]  ;;  %v4297_v26 = vld [vmem:[%s7142_s3 + $0x1d8] sm:$0xff]  ;;  %v4296_v28 = vld [vmem:[%s7142_s3 + $0x1d0] sm:$0xff] }
  0xfe   : > { %v561_v29 = vpop.f32.mrf.mxu0  ;;  %v4281_v27 = vld [vmem:[%s7142_s3 + $0x158] sm:$0xff] }
  0xff   : > { %v4280_v29 = vld [vmem:[%s7142_s3 + $0x150] sm:$0xff] }
 0x101   : > { %570 = vadd.xlane.f32.xlu0 %v569_v30  ;;  %v4295_v30 = vld [vmem:[%s7142_s3 + $0x1c8] sm:$0xff] }
 0x186   : > { %v566_v60 = vpop.xlane.xlu0 %565 }
 0x187   : > { %v572_v61 = vmul.f32 0.00390625, %v566_v60  ;;  %v694_v60 = vld [vmem:[%s7143_s4 + $0x8] sm:$0xff] }
 0x189   : > { %v574_v63 = vmul.f32 %v572_v61, %v572_v61  ;;  %v580_v12 = vsub.f32 %v5663_v23, %v572_v61  ;;  %v581_v13 = vsub.f32 %v5665_v24, %v572_v61  ;;  %v4283_v23 = vld [vmem:[%s7142_s3 + $0x168] sm:$0xff]  ;;  %v4298_v24 = vld [vmem:[%s7142_s3 + $0x1e0] sm:$0xff]  ;;  %v4323_v61 = vld [vmem:[%s7142_s3 + $0x278] sm:$0xff] }
 0x18a   : > { %v571_v62 = vpop.xlane.xlu0 %570 }
 0x18b   : > { %v573_v0 = vmul.f32 0.00390625, %v571_v62  ;;  %v4338_v62 = vld [vmem:[%s7142_s3 + $0x2f0] sm:$0xff] }
 0x18d   : > { %v575_v1 = vsub.f32 %v573_v0, %v574_v63  ;;  %v4322_v63 = vld [vmem:[%s7142_s3 + $0x270] sm:$0xff]  ;;  %v4337_v0 = vld [vmem:[%s7142_s3 + $0x2e8] sm:$0xff] }
 0x18f   : > { %v576_v2 = vmax.f32 %v575_v1, 0.0  ;;  %v4321_v1 = vld [vmem:[%s7142_s3 + $0x268] sm:$0xff] }
 0x191   : > { %v577_v3 = vadd.f32 1e-05, %v576_v2  ;;  %v4336_v2 = vld [vmem:[%s7142_s3 + $0x2e0] sm:$0xff] }
 0x193   : > { %5551 = vrsqrt.f32 %v577_v3  ;;  %v4320_v3 = vld [vmem:[%s7142_s3 + $0x260] sm:$0xff] }
 0x1a0   : > { %v5552_v7 = vpop.eup %5551 }
 0x1a1   : > { %v579_v9 = vmul.f32 %v5552_v7, %v563_v4  ;;  %v4335_v4 = vld [vmem:[%s7142_s3 + $0x2d8] sm:$0xff]  ;;  %v4318_v7 = vld [vmem:[%s7142_s3 + $0x250] sm:$0xff] }
 0x1a3   : > { %584 = vperm.xlu1 %5517, %v579_v9   ;;  %v4317_v9 = vld [vmem:[%s7142_s3 + $0x248] sm:$0xff] }
 0x21e   : > { %v585_v14 = vpop.permute.xlu1 %584 }
 0x21f   : > { %v587_v15 = vmul.f32 %v585_v14, %v580_v12  ;;  %v588_v16 = vmul.f32 %v585_v14, %v581_v13  ;;  %v4331_v12 = vld [vmem:[%s7142_s3 + $0x2b8] sm:$0xff]  ;;  %v4330_v14 = vld [vmem:[%s7142_s3 + $0x2b0] sm:$0xff] }
 0x220   : > { %v4315_v13 = vld [vmem:[%s7142_s3 + $0x238] sm:$0xff] }
 0x221   : > { %v5778_v17 = vmax.f32 %v587_v15, 0.0  ;;  %v5780_v18 = vmax.f32 %v588_v16, 0.0  ;;  %v4314_v15 = vld [vmem:[%s7142_s3 + $0x230] sm:$0xff]  ;;  %v4329_v16 = vld [vmem:[%s7142_s3 + $0x2a8] sm:$0xff] }
 0x223   : > { %687 = vmatprep.mubr.f32.mxu1 %v5780_v18 }
 0x224   : > { %688 = vmatmul.mubr.f32.vlgmr.msra.gmra.mxu1 %v5778_v17 }
 0x225   : > { %4751 = vmatpush3.msra.mxu1 %v4285_v19  ;;  %792 = vmatprep.mubr.f32.mxu1 %v5780_v18  ;;  %v4313_v19 = vld [vmem:[%s7142_s3 + $0x228] sm:$0xff] }
 0x226   : > { %4752 = vmatprep.subr.mxu1 %v4300_v20  ;;  %v4328_v20 = vld [vmem:[%s7142_s3 + $0x2a0] sm:$0xff] }
 0x227   : > { %4753 = vmatpush3.msra.mxu1 %v4284_v21  ;;  %v4312_v21 = vld [vmem:[%s7142_s3 + $0x220] sm:$0xff] }
 0x228   : > { %4754 = vmatprep.subr.mxu1 %v4299_v22  ;;  %v4327_v22 = vld [vmem:[%s7142_s3 + $0x298] sm:$0xff] }
 0x229   : > { %4755 = vmatpush3.msra.mxu1 %v4283_v23  ;;  %v4311_v23 = vld [vmem:[%s7142_s3 + $0x218] sm:$0xff] }
 0x22a   : > { %4756 = vmatprep.subr.mxu1 %v4298_v24  ;;  %v4326_v24 = vld [vmem:[%s7142_s3 + $0x290] sm:$0xff] }
 0x22b   : > { %4757 = vmatpush3.msra.mxu1 %v4282_v25  ;;  %v4310_v25 = vld [vmem:[%s7142_s3 + $0x210] sm:$0xff] }
 0x22c   : > { %4758 = vmatprep.subr.mxu1 %v4297_v26  ;;  %v4325_v26 = vld [vmem:[%s7142_s3 + $0x288] sm:$0xff] }
 0x22d   : > { %4759 = vmatpush3.msra.mxu1 %v4281_v27  ;;  %v4309_v27 = vld [vmem:[%s7142_s3 + $0x208] sm:$0xff] }
 0x22e   : > { %4760 = vmatprep.subr.mxu1 %v4296_v28  ;;  %v4324_v28 = vld [vmem:[%s7142_s3 + $0x280] sm:$0xff] }
 0x22f   : > { %4761 = vmatpush3.msra.mxu1 %v4280_v29  ;;  %v4308_v29 = vld [vmem:[%s7142_s3 + $0x200] sm:$0xff] }
 0x230   : > { %4762 = vmatprep.subr.mxu1 %v4295_v30  ;;  %v4340_v30 = vld [vmem:[%s7143_s4 + $0x20] sm:$0xff] }
 0x231   : > { %4763 = vmatpush3.msra.mxu1 %v4279_v31 }
 0x232   : > { %4764 = vmatprep.subr.mxu1 %v4294_v32 }
 0x233   : > { %4765 = vmatpush3.msra.mxu1 %v4278_v33 }
 0x234   : > { %4766 = vmatprep.subr.mxu1 %v4293_v34 }
 0x235   : > { %4767 = vmatpush3.msra.mxu1 %v4277_v35 }
 0x236   : > { %4768 = vmatprep.subr.mxu1 %v4292_v36 }
 0x237   : > { %4769 = vmatpush3.msra.mxu1 %v4276_v37 }
 0x238   : > { %4770 = vmatprep.subr.mxu1 %v4291_v38 }
 0x239   : > { %4771 = vmatpush3.msra.mxu1 %v4275_v39 }
 0x23a   : > { %4772 = vmatprep.subr.mxu1 %v4290_v40  ;;  %v4341_v40 = vld [vmem:[%s7143_s4 + $0x28] sm:$0xff] }
 0x23b   : > { %4773 = vmatpush3.msra.mxu1 %v4274_v41  ;;  %v4375_v41 = vld [vmem:[%s7142_s3 + $0x3f8] sm:$0xff] }
 0x23c   : > { %4774 = vmatprep.subr.mxu1 %v4289_v42  ;;  %v4359_v42 = vld [vmem:[%s7142_s3 + $0x378] sm:$0xff] }
 0x23d   : > { %4775 = vmatpush3.msra.mxu1 %v4273_v43  ;;  %v4374_v43 = vld [vmem:[%s7142_s3 + $0x3f0] sm:$0xff] }
 0x23e   : > { %4776 = vmatprep.subr.mxu1 %v4288_v44  ;;  %v4358_v44 = vld [vmem:[%s7142_s3 + $0x370] sm:$0xff] }
 0x23f   : > { %4777 = vmatpush3.msra.mxu1 %v4272_v45  ;;  %v4373_v45 = vld [vmem:[%s7142_s3 + $0x3e8] sm:$0xff] }
 0x240   : > { %4778 = vmatprep.subr.mxu1 %v4287_v46  ;;  %v4357_v46 = vld [vmem:[%s7142_s3 + $0x368] sm:$0xff] }
 0x241   : > { %4779 = vmatpush3.msra.mxu1 %v4271_v47  ;;  %v4372_v47 = vld [vmem:[%s7142_s3 + $0x3e0] sm:$0xff] }
 0x242   : > { %4780 = vmatprep.subr.mxu1 %v4286_v48  ;;  %v4356_v48 = vld [vmem:[%s7142_s3 + $0x360] sm:$0xff] }
 0x243   : > { %4781 = vmatpush3.msra.mxu1 %v4270_v49  ;;  %v4371_v49 = vld [vmem:[%s7142_s3 + $0x3d8] sm:$0xff] }
 0x244   : > { %793 = vmatmul.mubr.f32.vlgmr.msra.gmra.mxu1 %v5778_v17 }
 0x245   : > { %5213 = vmatprep.mubr.msk.f32.mxu1 %vm801_vm1, %v4340_v30  ;;  %v4406_v30 = vld [vmem:[%s7142_s3 + $0x4d0] sm:$0xff] }
 0x2e4   : > { %v4747_v51 = vpop.f32.mrf.mxu1 }
 0x2e6   : > { %v4748_v52 = vpop.f32.mrf.mxu1 }
 0x2e7   : > { %v4749_v57 = vadd.f32 %v4748_v52, %v4747_v51  ;;  %v4370_v51 = vld [vmem:[%s7142_s3 + $0x3d0] sm:$0xff] }
 0x2e8   : > { %v4354_v52 = vld [vmem:[%s7142_s3 + $0x350] sm:$0xff] }
 0x304   : > { %v4782_v53 = vpop.f32.mrf.mxu1 }
 0x306   : > { %v4783_v54 = vpop.f32.mrf.mxu1 }
 0x307   : > { %v4784_v55 = vadd.f32 %v4783_v54, %v4782_v53  ;;  %v4369_v53 = vld [vmem:[%s7142_s3 + $0x3c8] sm:$0xff] }
 0x308   : > { %v4353_v54 = vld [vmem:[%s7142_s3 + $0x348] sm:$0xff] }
 0x309   : > { %5201 = vmatprep.subr.mxu0 %v4784_v55 }
 0x30a   : > { %5202 = vmatpush3.msra.mxu0 %v4784_v55  ;;  %v4368_v55 = vld [vmem:[%s7142_s3 + $0x3c0] sm:$0xff] }
 0x30b   : > { %5204 = vmatmul.mubr.msk.f32.vlgmr.msra.gmra.mxu0 %vm801_vm1, %v4303_v56  ;;  %5206 = vmatprep.subr.mxu0 %v4749_v57  ;;  %v4352_v56 = vld [vmem:[%s7142_s3 + $0x340] sm:$0xff] }
 0x30c   : > { %5207 = vmatpush3.msra.mxu0 %v4749_v57  ;;  %5208 = vmatprep.mubr.msk.f32.mxu0 %vm801_vm1, %v693_v58  ;;  %v4367_v57 = vld [vmem:[%s7142_s3 + $0x3b8] sm:$0xff] }
 0x30d   : > { %4791 = vmatprep.subr.mxu0 %v4339_v59  ;;  %v4351_v58 = vld [vmem:[%s7142_s3 + $0x338] sm:$0xff]  ;;  %v4366_v59 = vld [vmem:[%s7142_s3 + $0x3b0] sm:$0xff] }
 0x30f   : > { %5209 = vmatmul.mubr.msk.f32.vlgmr.msra.gmra.mxu0 %vm801_vm1, %v694_v60  ;;  %v4350_v60 = vld [vmem:[%s7142_s3 + $0x330] sm:$0xff] }
 0x310   : > { %4792 = vmatpush3.msra.mxu0 %v4323_v61  ;;  %1061 = vmatprep.mubr.f32.mxu0 %v5780_v18  ;;  %v4365_v61 = vld [vmem:[%s7142_s3 + $0x3a8] sm:$0xff] }
 0x311   : > { %4793 = vmatprep.subr.mxu0 %v4338_v62  ;;  %v4349_v62 = vld [vmem:[%s7142_s3 + $0x328] sm:$0xff] }
 0x312   : > { %4794 = vmatpush3.msra.mxu0 %v4322_v63  ;;  %v4364_v63 = vld [vmem:[%s7142_s3 + $0x3a0] sm:$0xff] }
 0x313   : > { %4795 = vmatprep.subr.mxu0 %v4337_v0  ;;  %v4348_v0 = vld [vmem:[%s7142_s3 + $0x320] sm:$0xff] }
 0x314   : > { %4796 = vmatpush3.msra.mxu0 %v4321_v1  ;;  %v4363_v1 = vld [vmem:[%s7142_s3 + $0x398] sm:$0xff] }
 0x315   : > { %4797 = vmatprep.subr.mxu0 %v4336_v2  ;;  %v4347_v2 = vld [vmem:[%s7142_s3 + $0x318] sm:$0xff] }
 0x316   : > { %4798 = vmatpush3.msra.mxu0 %v4320_v3  ;;  %v4362_v3 = vld [vmem:[%s7142_s3 + $0x390] sm:$0xff] }
 0x317   : > { %4799 = vmatprep.subr.mxu0 %v4335_v4  ;;  %v4346_v4 = vld [vmem:[%s7142_s3 + $0x310] sm:$0xff] }
 0x318   : > { %4800 = vmatpush3.msra.mxu0 %v4319_v5  ;;  %v4361_v5 = vld [vmem:[%s7142_s3 + $0x388] sm:$0xff] }
 0x319   : > { %4801 = vmatprep.subr.mxu0 %v4334_v6  ;;  %v4345_v6 = vld [vmem:[%s7142_s3 + $0x308] sm:$0xff] }
 0x31a   : > { %4802 = vmatpush3.msra.mxu0 %v4318_v7  ;;  %v4360_v7 = vld [vmem:[%s7142_s3 + $0x380] sm:$0xff] }
 0x31b   : > { %4803 = vmatprep.subr.mxu0 %v4333_v8  ;;  %v4344_v8 = vld [vmem:[%s7142_s3 + $0x300] sm:$0xff] }
 0x31c   : > { %4804 = vmatpush3.msra.mxu0 %v4317_v9  ;;  %v4376_v9 = vld [vmem:[%s7143_s4 + $0x30] sm:$0xff] }
 0x31d   : > { %4805 = vmatprep.subr.mxu0 %v4332_v10 }
 0x31e   : > { %4806 = vmatpush3.msra.mxu0 %v4316_v11 }
 0x31f   : > { %4807 = vmatprep.subr.mxu0 %v4331_v12 }
 0x320   : > { %4808 = vmatpush3.msra.mxu0 %v4315_v13 }
 0x321   : > { %4809 = vmatprep.subr.mxu0 %v4330_v14 }
 0x322   : > { %4810 = vmatpush3.msra.mxu0 %v4314_v15 }
 0x323   : > { %4811 = vmatprep.subr.mxu0 %v4329_v16 }
 0x324   : > { %4812 = vmatpush3.msra.mxu0 %v4313_v19  ;;  %v4377_v19 = vld [vmem:[%s7143_s4 + $0x38] sm:$0xff] }
 0x325   : > { %4813 = vmatprep.subr.mxu0 %v4328_v20  ;;  %v4411_v20 = vld [vmem:[%s7142_s3 + $0x4f8] sm:$0xff] }
 0x326   : > { %4814 = vmatpush3.msra.mxu0 %v4312_v21  ;;  %v4395_v21 = vld [vmem:[%s7142_s3 + $0x478] sm:$0xff] }
 0x327   : > { %4815 = vmatprep.subr.mxu0 %v4327_v22  ;;  %v4410_v22 = vld [vmem:[%s7142_s3 + $0x4f0] sm:$0xff] }
 0x328   : > { %4816 = vmatpush3.msra.mxu0 %v4311_v23  ;;  %v4394_v23 = vld [vmem:[%s7142_s3 + $0x470] sm:$0xff] }
 0x329   : > { %4817 = vmatprep.subr.mxu0 %v4326_v24  ;;  %v4409_v24 = vld [vmem:[%s7142_s3 + $0x4e8] sm:$0xff] }
 0x32a   : > { %4818 = vmatpush3.msra.mxu0 %v4310_v25  ;;  %v4393_v25 = vld [vmem:[%s7142_s3 + $0x468] sm:$0xff] }
 0x32b   : > { %4819 = vmatprep.subr.mxu0 %v4325_v26  ;;  %v4408_v26 = vld [vmem:[%s7142_s3 + $0x4e0] sm:$0xff] }
 0x32c   : > { %4820 = vmatpush3.msra.mxu0 %v4309_v27  ;;  %v4392_v27 = vld [vmem:[%s7142_s3 + $0x460] sm:$0xff] }
 0x32d   : > { %4821 = vmatprep.subr.mxu0 %v4324_v28  ;;  %v4407_v28 = vld [vmem:[%s7142_s3 + $0x4d8] sm:$0xff] }
 0x32e   : > { %4822 = vmatpush3.msra.mxu0 %v4308_v29  ;;  %v4391_v29 = vld [vmem:[%s7142_s3 + $0x458] sm:$0xff] }
 0x32f   : > { %1062 = vmatmul.mubr.f32.vlgmr.msra.gmra.mxu0 %v5778_v17 }
 0x330   : > { %5218 = vmatprep.mubr.msk.f32.mxu0 %vm801_vm1, %v4376_v9  ;;  %v4441_v9 = vld [vmem:[%s7142_s3 + $0x5c8] sm:$0xff] }
 0x3cb   : > { %v5205_v31 = vpop.f32.mrf.mxu0 }
 0x3cd   : > { %v874_v32 = vpop.f32.mrf.mxu0 }
 0x3cf   : > { %v5210_v33 = vpop.f32.mrf.mxu0 }
 0x3d0   : > { %v5997_v34 = vadd.f32 %v5210_v33, %v5205_v31  ;;  %v4390_v31 = vld [vmem:[%s7142_s3 + $0x450] sm:$0xff]  ;;  %v4389_v33 = vld [vmem:[%s7142_s3 + $0x448] sm:$0xff] }
 0x3d1   : > { %v955_v35 = vpop.f32.mrf.mxu0 }
 0x3d2   : > { %v5999_v36 = vadd.f32 %v955_v35, %v874_v32  ;;  %v4405_v32 = vld [vmem:[%s7142_s3 + $0x4c8] sm:$0xff]  ;;  %v4388_v35 = vld [vmem:[%s7142_s3 + $0x440] sm:$0xff] }
 0x3ef   : > { %v4823_v37 = vpop.f32.mrf.mxu0 }
 0x3f1   : > { %v4824_v38 = vpop.f32.mrf.mxu0 }
 0x3f2   : > { %v4825_v39 = vadd.f32 %v4824_v38, %v4823_v37  ;;  %v4387_v37 = vld [vmem:[%s7142_s3 + $0x438] sm:$0xff]  ;;  %v4402_v38 = vld [vmem:[%s7142_s3 + $0x4b0] sm:$0xff] }
 0x3f4   : > { %5211 = vmatprep.subr.mxu1 %v4825_v39 }
 0x3f5   : > { %5212 = vmatpush3.msra.mxu1 %v4825_v39  ;;  %v4386_v39 = vld [vmem:[%s7142_s3 + $0x430] sm:$0xff] }
 0x3f6   : > { %5214 = vmatmul.mubr.msk.f32.vlgmr.msra.gmra.mxu1 %vm801_vm1, %v4341_v40  ;;  %4829 = vmatprep.subr.mxu1 %v4375_v41  ;;  %v4401_v40 = vld [vmem:[%s7142_s3 + $0x4a8] sm:$0xff] }
 0x3f7   : > { %4830 = vmatpush3.msra.mxu1 %v4359_v42  ;;  %1250 = vmatprep.mubr.f32.mxu1 %v5780_v18  ;;  %v4385_v41 = vld [vmem:[%s7142_s3 + $0x428] sm:$0xff]  ;;  %v4400_v42 = vld [vmem:[%s7142_s3 + $0x4a0] sm:$0xff] }
 0x3f8   : > { %4831 = vmatprep.subr.mxu1 %v4374_v43  ;;  %v4384_v43 = vld [vmem:[%s7142_s3 + $0x420] sm:$0xff] }
 0x3f9   : > { %4832 = vmatpush3.msra.mxu1 %v4358_v44  ;;  %v4399_v44 = vld [vmem:[%s7142_s3 + $0x498] sm:$0xff] }
 0x3fa   : > { %4833 = vmatprep.subr.mxu1 %v4373_v45  ;;  %v4383_v45 = vld [vmem:[%s7142_s3 + $0x418] sm:$0xff] }
 0x3fb   : > { %4834 = vmatpush3.msra.mxu1 %v4357_v46  ;;  %v4398_v46 = vld [vmem:[%s7142_s3 + $0x490] sm:$0xff] }
 0x3fc   : > { %4835 = vmatprep.subr.mxu1 %v4372_v47  ;;  %v4382_v47 = vld [vmem:[%s7142_s3 + $0x410] sm:$0xff] }
 0x3fd   : > { %4836 = vmatpush3.msra.mxu1 %v4356_v48  ;;  %v4397_v48 = vld [vmem:[%s7142_s3 + $0x488] sm:$0xff] }
 0x3fe   : > { %4837 = vmatprep.subr.mxu1 %v4371_v49  ;;  %v4381_v49 = vld [vmem:[%s7142_s3 + $0x408] sm:$0xff] }
 0x3ff   : > { %4838 = vmatpush3.msra.mxu1 %v4355_v50  ;;  %v4396_v50 = vld [vmem:[%s7142_s3 + $0x480] sm:$0xff] }
 0x400   : > { %4839 = vmatprep.subr.mxu1 %v4370_v51  ;;  %v4380_v51 = vld [vmem:[%s7142_s3 + $0x400] sm:$0xff] }
 0x401   : > { %4840 = vmatpush3.msra.mxu1 %v4354_v52  ;;  %v4412_v52 = vld [vmem:[%s7143_s4 + $0x40] sm:$0xff] }
 0x402   : > { %4841 = vmatprep.subr.mxu1 %v4369_v53 }
 0x403   : > { %4842 = vmatpush3.msra.mxu1 %v4353_v54 }
 0x404   : > { %4843 = vmatprep.subr.mxu1 %v4368_v55 }
 0x405   : > { %4844 = vmatpush3.msra.mxu1 %v4352_v56 }
 0x406   : > { %4845 = vmatprep.subr.mxu1 %v4367_v57 }
 0x407   : > { %4846 = vmatpush3.msra.mxu1 %v4351_v58 }
 0x408   : > { %4847 = vmatprep.subr.mxu1 %v4366_v59 }
 0x409   : > { %4848 = vmatpush3.msra.mxu1 %v4350_v60  ;;  %v4413_v60 = vld [vmem:[%s7143_s4 + $0x48] sm:$0xff] }
 0x40a   : > { %4849 = vmatprep.subr.mxu1 %v4365_v61  ;;  %v4447_v61 = vld [vmem:[%s7142_s3 + $0x5f8] sm:$0xff] }
 0x40b   : > { %4850 = vmatpush3.msra.mxu1 %v4349_v62  ;;  %v4431_v62 = vld [vmem:[%s7142_s3 + $0x578] sm:$0xff] }
 0x40c   : > { %4851 = vmatprep.subr.mxu1 %v4364_v63  ;;  %v4446_v63 = vld [vmem:[%s7142_s3 + $0x5f0] sm:$0xff] }
 0x40d   : > { %4852 = vmatpush3.msra.mxu1 %v4348_v0  ;;  %v4430_v0 = vld [vmem:[%s7142_s3 + $0x570] sm:$0xff] }
 0x40e   : > { %4853 = vmatprep.subr.mxu1 %v4363_v1  ;;  %v4445_v1 = vld [vmem:[%s7142_s3 + $0x5e8] sm:$0xff] }
 0x40f   : > { %4854 = vmatpush3.msra.mxu1 %v4347_v2  ;;  %v4429_v2 = vld [vmem:[%s7142_s3 + $0x568] sm:$0xff] }
 0x410   : > { %4855 = vmatprep.subr.mxu1 %v4362_v3  ;;  %v4444_v3 = vld [vmem:[%s7142_s3 + $0x5e0] sm:$0xff] }
 0x411   : > { %4856 = vmatpush3.msra.mxu1 %v4346_v4  ;;  %v4428_v4 = vld [vmem:[%s7142_s3 + $0x560] sm:$0xff] }
 0x412   : > { %4857 = vmatprep.subr.mxu1 %v4361_v5  ;;  %v4443_v5 = vld [vmem:[%s7142_s3 + $0x5d8] sm:$0xff] }
 0x413   : > { %4858 = vmatpush3.msra.mxu1 %v4345_v6  ;;  %v4427_v6 = vld [vmem:[%s7142_s3 + $0x558] sm:$0xff] }
 0x414   : > { %4859 = vmatprep.subr.mxu1 %v4360_v7  ;;  %v4442_v7 = vld [vmem:[%s7142_s3 + $0x5d0] sm:$0xff] }
 0x415   : > { %4860 = vmatpush3.msra.mxu1 %v4344_v8  ;;  %v4426_v8 = vld [vmem:[%s7142_s3 + $0x550] sm:$0xff] }
 0x416   : > { %1251 = vmatmul.mubr.f32.vlgmr.msra.gmra.mxu1 %v5778_v17 }
 0x417   : > { %5223 = vmatprep.mubr.msk.f32.mxu1 %vm801_vm1, %v4412_v52  ;;  %v4477_v52 = vld [vmem:[%s7142_s3 + $0x6c8] sm:$0xff] }
 0x4b6   : > { %v5215_v10 = vpop.f32.mrf.mxu1 }
 0x4b7   : > { %v6108_v11 = vadd.f32 %v5215_v10, %v5997_v34  ;;  %v4404_v34 = vld [vmem:[%s7142_s3 + $0x4c0] sm:$0xff]  ;;  %v4425_v10 = vld [vmem:[%s7142_s3 + $0x548] sm:$0xff] }
 0x4b8   : > { %v1142_v12 = vpop.f32.mrf.mxu1 }
 0x4b9   : > { %v6111_v13 = vadd.f32 %v1142_v12, %v5999_v36  ;;  %v4403_v36 = vld [vmem:[%s7142_s3 + $0x4b8] sm:$0xff]  ;;  %v4424_v12 = vld [vmem:[%s7142_s3 + $0x540] sm:$0xff] }
 0x4d6   : > { %v4861_v14 = vpop.f32.mrf.mxu1 }
 0x4d8   : > { %v4862_v15 = vpop.f32.mrf.mxu1 }
 0x4d9   : > { %v4863_v16 = vadd.f32 %v4862_v15, %v4861_v14  ;;  %v4423_v14 = vld [vmem:[%s7142_s3 + $0x538] sm:$0xff]  ;;  %v4438_v15 = vld [vmem:[%s7142_s3 + $0x5b0] sm:$0xff] }
 0x4db   : > { %5216 = vmatprep.subr.mxu0 %v4863_v16 }
 0x4dc   : > { %5217 = vmatpush3.msra.mxu0 %v4863_v16  ;;  %v4422_v16 = vld [vmem:[%s7142_s3 + $0x530] sm:$0xff] }
 0x4dd   : > { %5219 = vmatmul.mubr.msk.f32.vlgmr.msra.gmra.mxu0 %vm801_vm1, %v4377_v19  ;;  %4867 = vmatprep.subr.mxu0 %v4411_v20  ;;  %v4437_v19 = vld [vmem:[%s7142_s3 + $0x5a8] sm:$0xff] }
 0x4de   : > { %4868 = vmatpush3.msra.mxu0 %v4395_v21  ;;  %1439 = vmatprep.mubr.f32.mxu0 %v5780_v18  ;;  %v4421_v20 = vld [vmem:[%s7142_s3 + $0x528] sm:$0xff]  ;;  %v4436_v21 = vld [vmem:[%s7142_s3 + $0x5a0] sm:$0xff] }
 0x4df   : > { %4869 = vmatprep.subr.mxu0 %v4410_v22  ;;  %v4420_v22 = vld [vmem:[%s7142_s3 + $0x520] sm:$0xff] }
 0x4e0   : > { %4870 = vmatpush3.msra.mxu0 %v4394_v23  ;;  %v4435_v23 = vld [vmem:[%s7142_s3 + $0x598] sm:$0xff] }
 0x4e1   : > { %4871 = vmatprep.subr.mxu0 %v4409_v24  ;;  %v4419_v24 = vld [vmem:[%s7142_s3 + $0x518] sm:$0xff] }
 0x4e2   : > { %4872 = vmatpush3.msra.mxu0 %v4393_v25  ;;  %v4434_v25 = vld [vmem:[%s7142_s3 + $0x590] sm:$0xff] }
 0x4e3   : > { %4873 = vmatprep.subr.mxu0 %v4408_v26  ;;  %v4418_v26 = vld [vmem:[%s7142_s3 + $0x510] sm:$0xff] }
 0x4e4   : > { %4874 = vmatpush3.msra.mxu0 %v4392_v27  ;;  %v4433_v27 = vld [vmem:[%s7142_s3 + $0x588] sm:$0xff] }
 0x4e5   : > { %4875 = vmatprep.subr.mxu0 %v4407_v28  ;;  %v4417_v28 = vld [vmem:[%s7142_s3 + $0x508] sm:$0xff] }
 0x4e6   : > { %4876 = vmatpush3.msra.mxu0 %v4391_v29  ;;  %v4432_v29 = vld [vmem:[%s7142_s3 + $0x580] sm:$0xff] }
 0x4e7   : > { %4877 = vmatprep.subr.mxu0 %v4406_v30  ;;  %v4416_v30 = vld [vmem:[%s7142_s3 + $0x500] sm:$0xff] }
 0x4e8   : > { %4878 = vmatpush3.msra.mxu0 %v4390_v31  ;;  %v4448_v31 = vld [vmem:[%s7143_s4 + $0x50] sm:$0xff] }
 0x4e9   : > { %4879 = vmatprep.subr.mxu0 %v4405_v32 }
 0x4ea   : > { %4880 = vmatpush3.msra.mxu0 %v4389_v33 }
 0x4eb   : > { %4881 = vmatprep.subr.mxu0 %v4404_v34 }
 0x4ec   : > { %4882 = vmatpush3.msra.mxu0 %v4388_v35 }
 0x4ed   : > { %4883 = vmatprep.subr.mxu0 %v4403_v36 }
 0x4ee   : > { %4884 = vmatpush3.msra.mxu0 %v4387_v37 }
 0x4ef   : > { %4885 = vmatprep.subr.mxu0 %v4402_v38 }
 0x4f0   : > { %4886 = vmatpush3.msra.mxu0 %v4386_v39  ;;  %v4449_v39 = vld [vmem:[%s7143_s4 + $0x58] sm:$0xff] }
 0x4f1   : > { %4887 = vmatprep.subr.mxu0 %v4401_v40  ;;  %v4483_v40 = vld [vmem:[%s7142_s3 + $0x6f8] sm:$0xff] }
 0x4f2   : > { %4888 = vmatpush3.msra.mxu0 %v4385_v41  ;;  %v4467_v41 = vld [vmem:[%s7142_s3 + $0x678] sm:$0xff] }
 0x4f3   : > { %4889 = vmatprep.subr.mxu0 %v4400_v42  ;;  %v4482_v42 = vld [vmem:[%s7142_s3 + $0x6f0] sm:$0xff] }
 0x4f4   : > { %4890 = vmatpush3.msra.mxu0 %v4384_v43  ;;  %v4466_v43 = vld [vmem:[%s7142_s3 + $0x670] sm:$0xff] }
 0x4f5   : > { %4891 = vmatprep.subr.mxu0 %v4399_v44  ;;  %v4481_v44 = vld [vmem:[%s7142_s3 + $0x6e8] sm:$0xff] }
 0x4f6   : > { %4892 = vmatpush3.msra.mxu0 %v4383_v45  ;;  %v4465_v45 = vld [vmem:[%s7142_s3 + $0x668] sm:$0xff] }
 0x4f7   : > { %4893 = vmatprep.subr.mxu0 %v4398_v46  ;;  %v4480_v46 = vld [vmem:[%s7142_s3 + $0x6e0] sm:$0xff] }
 0x4f8   : > { %4894 = vmatpush3.msra.mxu0 %v4382_v47  ;;  %v4464_v47 = vld [vmem:[%s7142_s3 + $0x660] sm:$0xff] }
 0x4f9   : > { %4895 = vmatprep.subr.mxu0 %v4397_v48  ;;  %v4479_v48 = vld [vmem:[%s7142_s3 + $0x6d8] sm:$0xff] }
 0x4fa   : > { %4896 = vmatpush3.msra.mxu0 %v4381_v49  ;;  %v4463_v49 = vld [vmem:[%s7142_s3 + $0x658] sm:$0xff] }
 0x4fb   : > { %4897 = vmatprep.subr.mxu0 %v4396_v50  ;;  %v4478_v50 = vld [vmem:[%s7142_s3 + $0x6d0] sm:$0xff] }
 0x4fc   : > { %4898 = vmatpush3.msra.mxu0 %v4380_v51  ;;  %v4462_v51 = vld [vmem:[%s7142_s3 + $0x650] sm:$0xff] }
 0x4fd   : > { %1440 = vmatmul.mubr.f32.vlgmr.msra.gmra.mxu0 %v5778_v17 }
 0x4fe   : > { %5228 = vmatprep.mubr.msk.f32.mxu0 %vm801_vm1, %v4448_v31  ;;  %v4513_v31 = vld [vmem:[%s7142_s3 + $0x7c8] sm:$0xff] }
 0x59d   : > { %v5220_v53 = vpop.f32.mrf.mxu0 }
 0x59e   : > { %v6220_v54 = vadd.f32 %v5220_v53, %v6108_v11  ;;  %v4440_v11 = vld [vmem:[%s7142_s3 + $0x5c0] sm:$0xff]  ;;  %v4461_v53 = vld [vmem:[%s7142_s3 + $0x648] sm:$0xff] }
 0x59f   : > { %v1331_v55 = vpop.f32.mrf.mxu0 }
 0x5a0   : > { %v6223_v56 = vadd.f32 %v1331_v55, %v6111_v13  ;;  %v4439_v13 = vld [vmem:[%s7142_s3 + $0x5b8] sm:$0xff]  ;;  %v4460_v55 = vld [vmem:[%s7142_s3 + $0x640] sm:$0xff] }
 0x5bd   : > { %v4899_v57 = vpop.f32.mrf.mxu0 }
 0x5bf   : > { %v4900_v58 = vpop.f32.mrf.mxu0 }
 0x5c0   : > { %v4901_v59 = vadd.f32 %v4900_v58, %v4899_v57  ;;  %v4459_v57 = vld [vmem:[%s7142_s3 + $0x638] sm:$0xff]  ;;  %v4474_v58 = vld [vmem:[%s7142_s3 + $0x6b0] sm:$0xff] }
 0x5c2   : > { %5221 = vmatprep.subr.mxu1 %v4901_v59 }
 0x5c3   : > { %5222 = vmatpush3.msra.mxu1 %v4901_v59  ;;  %v4458_v59 = vld [vmem:[%s7142_s3 + $0x630] sm:$0xff] }
 0x5c4   : > { %5224 = vmatmul.mubr.msk.f32.vlgmr.msra.gmra.mxu1 %vm801_vm1, %v4413_v60  ;;  %4905 = vmatprep.subr.mxu1 %v4447_v61  ;;  %v4473_v60 = vld [vmem:[%s7142_s3 + $0x6a8] sm:$0xff] }
 0x5c5   : > { %4906 = vmatpush3.msra.mxu1 %v4431_v62  ;;  %1628 = vmatprep.mubr.f32.mxu1 %v5780_v18  ;;  %v4457_v61 = vld [vmem:[%s7142_s3 + $0x628] sm:$0xff]  ;;  %v4472_v62 = vld [vmem:[%s7142_s3 + $0x6a0] sm:$0xff] }
 0x5c6   : > { %4907 = vmatprep.subr.mxu1 %v4446_v63  ;;  %v4456_v63 = vld [vmem:[%s7142_s3 + $0x620] sm:$0xff] }
 0x5c7   : > { %4908 = vmatpush3.msra.mxu1 %v4430_v0  ;;  %v4471_v0 = vld [vmem:[%s7142_s3 + $0x698] sm:$0xff] }
 0x5c8   : > { %4909 = vmatprep.subr.mxu1 %v4445_v1  ;;  %v4455_v1 = vld [vmem:[%s7142_s3 + $0x618] sm:$0xff] }
 0x5c9   : > { %4910 = vmatpush3.msra.mxu1 %v4429_v2  ;;  %v4470_v2 = vld [vmem:[%s7142_s3 + $0x690] sm:$0xff] }
 0x5ca   : > { %4911 = vmatprep.subr.mxu1 %v4444_v3  ;;  %v4454_v3 = vld [vmem:[%s7142_s3 + $0x610] sm:$0xff] }
 0x5cb   : > { %4912 = vmatpush3.msra.mxu1 %v4428_v4  ;;  %v4469_v4 = vld [vmem:[%s7142_s3 + $0x688] sm:$0xff] }
 0x5cc   : > { %4913 = vmatprep.subr.mxu1 %v4443_v5  ;;  %v4453_v5 = vld [vmem:[%s7142_s3 + $0x608] sm:$0xff] }
 0x5cd   : > { %4914 = vmatpush3.msra.mxu1 %v4427_v6  ;;  %v4468_v6 = vld [vmem:[%s7142_s3 + $0x680] sm:$0xff] }
 0x5ce   : > { %4915 = vmatprep.subr.mxu1 %v4442_v7  ;;  %v4452_v7 = vld [vmem:[%s7142_s3 + $0x600] sm:$0xff] }
 0x5cf   : > { %4916 = vmatpush3.msra.mxu1 %v4426_v8  ;;  %v4484_v8 = vld [vmem:[%s7143_s4 + $0x60] sm:$0xff] }
 0x5d0   : > { %4917 = vmatprep.subr.mxu1 %v4441_v9 }
 0x5d1   : > { %4918 = vmatpush3.msra.mxu1 %v4425_v10 }
 0x5d2   : > { %4919 = vmatprep.subr.mxu1 %v4440_v11 }
 0x5d3   : > { %4920 = vmatpush3.msra.mxu1 %v4424_v12 }
 0x5d4   : > { %4921 = vmatprep.subr.mxu1 %v4439_v13 }
 0x5d5   : > { %4922 = vmatpush3.msra.mxu1 %v4423_v14 }
 0x5d6   : > { %4923 = vmatprep.subr.mxu1 %v4438_v15 }
 0x5d7   : > { %4924 = vmatpush3.msra.mxu1 %v4422_v16  ;;  %v4485_v16 = vld [vmem:[%s7143_s4 + $0x68] sm:$0xff] }
 0x5d8   : > { %4925 = vmatprep.subr.mxu1 %v4437_v19  ;;  %v4519_v19 = vld [vmem:[%s7142_s3 + $0x7f8] sm:$0xff] }
 0x5d9   : > { %4926 = vmatpush3.msra.mxu1 %v4421_v20  ;;  %v4503_v20 = vld [vmem:[%s7142_s3 + $0x778] sm:$0xff] }
 0x5da   : > { %4927 = vmatprep.subr.mxu1 %v4436_v21  ;;  %v4518_v21 = vld [vmem:[%s7142_s3 + $0x7f0] sm:$0xff] }
 0x5db   : > { %4928 = vmatpush3.msra.mxu1 %v4420_v22  ;;  %v4502_v22 = vld [vmem:[%s7142_s3 + $0x770] sm:$0xff] }
 0x5dc   : > { %4929 = vmatprep.subr.mxu1 %v4435_v23  ;;  %v4517_v23 = vld [vmem:[%s7142_s3 + $0x7e8] sm:$0xff] }
 0x5dd   : > { %4930 = vmatpush3.msra.mxu1 %v4419_v24  ;;  %v4501_v24 = vld [vmem:[%s7142_s3 + $0x768] sm:$0xff] }
 0x5de   : > { %4931 = vmatprep.subr.mxu1 %v4434_v25  ;;  %v4516_v25 = vld [vmem:[%s7142_s3 + $0x7e0] sm:$0xff] }
 0x5df   : > { %4932 = vmatpush3.msra.mxu1 %v4418_v26  ;;  %v4500_v26 = vld [vmem:[%s7142_s3 + $0x760] sm:$0xff] }
 0x5e0   : > { %4933 = vmatprep.subr.mxu1 %v4433_v27  ;;  %v4515_v27 = vld [vmem:[%s7142_s3 + $0x7d8] sm:$0xff] }
 0x5e1   : > { %4934 = vmatpush3.msra.mxu1 %v4417_v28  ;;  %v4499_v28 = vld [vmem:[%s7142_s3 + $0x758] sm:$0xff] }
 0x5e2   : > { %4935 = vmatprep.subr.mxu1 %v4432_v29  ;;  %v4514_v29 = vld [vmem:[%s7142_s3 + $0x7d0] sm:$0xff] }
 0x5e3   : > { %4936 = vmatpush3.msra.mxu1 %v4416_v30  ;;  %v4498_v30 = vld [vmem:[%s7142_s3 + $0x750] sm:$0xff] }
 0x5e4   : > { %1629 = vmatmul.mubr.f32.vlgmr.msra.gmra.mxu1 %v5778_v17 }
 0x5e5   : > { %5233 = vmatprep.mubr.msk.f32.mxu1 %vm801_vm1, %v4484_v8  ;;  %v4533_v8 = vld [vmem:[%s7142_s3 + $0x848] sm:$0xff] }
 0x684   : > { %v5225_v32 = vpop.f32.mrf.mxu1 }
 0x685   : > { %v6332_v33 = vadd.f32 %v5225_v32, %v6220_v54  ;;  %v4476_v54 = vld [vmem:[%s7142_s3 + $0x6c0] sm:$0xff]  ;;  %v4497_v32 = vld [vmem:[%s7142_s3 + $0x748] sm:$0xff] }
 0x686   : > { %v1520_v34 = vpop.f32.mrf.mxu1 }
 0x687   : > { %v6335_v35 = vadd.f32 %v1520_v34, %v6223_v56  ;;  %v4475_v56 = vld [vmem:[%s7142_s3 + $0x6b8] sm:$0xff]  ;;  %v4496_v34 = vld [vmem:[%s7142_s3 + $0x740] sm:$0xff] }
 0x6a4   : > { %v4937_v36 = vpop.f32.mrf.mxu1 }
 0x6a6   : > { %v4938_v37 = vpop.f32.mrf.mxu1 }
 0x6a7   : > { %v4939_v38 = vadd.f32 %v4938_v37, %v4937_v36  ;;  %v4495_v36 = vld [vmem:[%s7142_s3 + $0x738] sm:$0xff]  ;;  %v4510_v37 = vld [vmem:[%s7142_s3 + $0x7b0] sm:$0xff] }
 0x6a9   : > { %5226 = vmatprep.subr.mxu0 %v4939_v38 }
 0x6aa   : > { %5227 = vmatpush3.msra.mxu0 %v4939_v38  ;;  %v4494_v38 = vld [vmem:[%s7142_s3 + $0x730] sm:$0xff] }
 0x6ab   : > { %5229 = vmatmul.mubr.msk.f32.vlgmr.msra.gmra.mxu0 %vm801_vm1, %v4449_v39  ;;  %4943 = vmatprep.subr.mxu0 %v4483_v40  ;;  %v4509_v39 = vld [vmem:[%s7142_s3 + $0x7a8] sm:$0xff] }
 0x6ac   : > { %4944 = vmatpush3.msra.mxu0 %v4467_v41  ;;  %1817 = vmatprep.mubr.f32.mxu0 %v5780_v18  ;;  %v4493_v40 = vld [vmem:[%s7142_s3 + $0x728] sm:$0xff]  ;;  %v4508_v41 = vld [vmem:[%s7142_s3 + $0x7a0] sm:$0xff] }
 0x6ad   : > { %4945 = vmatprep.subr.mxu0 %v4482_v42  ;;  %v4492_v42 = vld [vmem:[%s7142_s3 + $0x720] sm:$0xff] }
 0x6ae   : > { %4946 = vmatpush3.msra.mxu0 %v4466_v43  ;;  %v4507_v43 = vld [vmem:[%s7142_s3 + $0x798] sm:$0xff] }
 0x6af   : > { %4947 = vmatprep.subr.mxu0 %v4481_v44  ;;  %v4491_v44 = vld [vmem:[%s7142_s3 + $0x718] sm:$0xff] }
 0x6b0   : > { %4948 = vmatpush3.msra.mxu0 %v4465_v45  ;;  %v4506_v45 = vld [vmem:[%s7142_s3 + $0x790] sm:$0xff] }
 0x6b1   : > { %4949 = vmatprep.subr.mxu0 %v4480_v46  ;;  %v4490_v46 = vld [vmem:[%s7142_s3 + $0x710] sm:$0xff] }
 0x6b2   : > { %4950 = vmatpush3.msra.mxu0 %v4464_v47  ;;  %v4505_v47 = vld [vmem:[%s7142_s3 + $0x788] sm:$0xff] }
 0x6b3   : > { %4951 = vmatprep.subr.mxu0 %v4479_v48  ;;  %v4489_v48 = vld [vmem:[%s7142_s3 + $0x708] sm:$0xff] }
 0x6b4   : > { %4952 = vmatpush3.msra.mxu0 %v4463_v49  ;;  %v4504_v49 = vld [vmem:[%s7142_s3 + $0x780] sm:$0xff] }
 0x6b5   : > { %4953 = vmatprep.subr.mxu0 %v4478_v50  ;;  %v4488_v50 = vld [vmem:[%s7142_s3 + $0x700] sm:$0xff] }
 0x6b6   : > { %4954 = vmatpush3.msra.mxu0 %v4462_v51  ;;  %v4520_v51 = vld [vmem:[%s7143_s4 + $0x70] sm:$0xff] }
 0x6b7   : > { %4955 = vmatprep.subr.mxu0 %v4477_v52 }
 0x6b8   : > { %4956 = vmatpush3.msra.mxu0 %v4461_v53 }
 0x6b9   : > { %4957 = vmatprep.subr.mxu0 %v4476_v54 }
 0x6ba   : > { %4958 = vmatpush3.msra.mxu0 %v4460_v55 }
 0x6bb   : > { %4959 = vmatprep.subr.mxu0 %v4475_v56 }
 0x6bc   : > { %4960 = vmatpush3.msra.mxu0 %v4459_v57 }
 0x6bd   : > { %4961 = vmatprep.subr.mxu0 %v4474_v58 }
 0x6be   : > { %4962 = vmatpush3.msra.mxu0 %v4458_v59  ;;  %v4521_v59 = vld [vmem:[%s7143_s4 + $0x78] sm:$0xff] }
 0x6bf   : > { %4963 = vmatprep.subr.mxu0 %v4473_v60  ;;  %v4555_v60 = vld [vmem:[%s7142_s3 + $0x8f8] sm:$0xff] }
 0x6c0   : > { %4964 = vmatpush3.msra.mxu0 %v4457_v61  ;;  %v4539_v61 = vld [vmem:[%s7142_s3 + $0x878] sm:$0xff] }
 0x6c1   : > { %4965 = vmatprep.subr.mxu0 %v4472_v62  ;;  %v4554_v62 = vld [vmem:[%s7142_s3 + $0x8f0] sm:$0xff] }
 0x6c2   : > { %4966 = vmatpush3.msra.mxu0 %v4456_v63  ;;  %v4538_v63 = vld [vmem:[%s7142_s3 + $0x870] sm:$0xff] }
 0x6c3   : > { %4967 = vmatprep.subr.mxu0 %v4471_v0  ;;  %v4553_v0 = vld [vmem:[%s7142_s3 + $0x8e8] sm:$0xff] }
 0x6c4   : > { %4968 = vmatpush3.msra.mxu0 %v4455_v1  ;;  %v4537_v1 = vld [vmem:[%s7142_s3 + $0x868] sm:$0xff] }
 0x6c5   : > { %4969 = vmatprep.subr.mxu0 %v4470_v2  ;;  %v4552_v2 = vld [vmem:[%s7142_s3 + $0x8e0] sm:$0xff] }
 0x6c6   : > { %4970 = vmatpush3.msra.mxu0 %v4454_v3  ;;  %v4536_v3 = vld [vmem:[%s7142_s3 + $0x860] sm:$0xff] }
 0x6c7   : > { %4971 = vmatprep.subr.mxu0 %v4469_v4  ;;  %v4535_v4 = vld [vmem:[%s7142_s3 + $0x858] sm:$0xff] }
 0x6c8   : > { %4972 = vmatpush3.msra.mxu0 %v4453_v5  ;;  %v4550_v5 = vld [vmem:[%s7142_s3 + $0x8d0] sm:$0xff] }
 0x6c9   : > { %4973 = vmatprep.subr.mxu0 %v4468_v6  ;;  %v4534_v6 = vld [vmem:[%s7142_s3 + $0x850] sm:$0xff] }
 0x6ca   : > { %4974 = vmatpush3.msra.mxu0 %v4452_v7  ;;  %v4549_v7 = vld [vmem:[%s7142_s3 + $0x8c8] sm:$0xff] }
 0x6cb   : > { %1818 = vmatmul.mubr.f32.vlgmr.msra.gmra.mxu0 %v5778_v17 }
 0x6cc   : > { %5238 = vmatprep.mubr.msk.f32.mxu0 %vm801_vm1, %v4520_v51  ;;  %v2341_v51 = vld [vmem:[%s7145_s6 + $0x28] sm:$0xff] }
 0x76b   : > { %v5230_v9 = vpop.f32.mrf.mxu0 }
 0x76c   : > { %v6444_v10 = vadd.f32 %v5230_v9, %v6332_v33  ;;  %v4512_v33 = vld [vmem:[%s7142_s3 + $0x7c0] sm:$0xff] }
 0x76d   : > { %v1709_v11 = vpop.f32.mrf.mxu0  ;;  %v4548_v9 = vld [vmem:[%s7142_s3 + $0x8c0] sm:$0xff] }
 0x76e   : > { %v6447_v12 = vadd.f32 %v1709_v11, %v6335_v35  ;;  %v4511_v35 = vld [vmem:[%s7142_s3 + $0x7b8] sm:$0xff] }
 0x76f   : > { %v4547_v11 = vld [vmem:[%s7142_s3 + $0x8b8] sm:$0xff] }
 0x78b   : > { %v4975_v13 = vpop.f32.mrf.mxu0 }
 0x78d   : > { %v4976_v14 = vpop.f32.mrf.mxu0 }
 0x78e   : > { %v4977_v15 = vadd.f32 %v4976_v14, %v4975_v13  ;;  %v4546_v13 = vld [vmem:[%s7142_s3 + $0x8b0] sm:$0xff] }
 0x78f   : > { %v4530_v14 = vld [vmem:[%s7142_s3 + $0x830] sm:$0xff] }
 0x790   : > { %5231 = vmatprep.subr.mxu1 %v4977_v15 }
 0x791   : > { %5232 = vmatpush3.msra.mxu1 %v4977_v15  ;;  %v4545_v15 = vld [vmem:[%s7142_s3 + $0x8a8] sm:$0xff] }
 0x792   : > { %5234 = vmatmul.mubr.msk.f32.vlgmr.msra.gmra.mxu1 %vm801_vm1, %v4485_v16  ;;  %4981 = vmatprep.subr.mxu1 %v4519_v19  ;;  %v4529_v16 = vld [vmem:[%s7142_s3 + $0x828] sm:$0xff]  ;;  %v4544_v19 = vld [vmem:[%s7142_s3 + $0x8a0] sm:$0xff] }
 0x793   : > { %4982 = vmatpush3.msra.mxu1 %v4503_v20  ;;  %2006 = vmatprep.mubr.f32.mxu1 %v5780_v18  ;;  %v4528_v20 = vld [vmem:[%s7142_s3 + $0x820] sm:$0xff] }
 0x794   : > { %4983 = vmatprep.subr.mxu1 %v4518_v21  ;;  %v4543_v21 = vld [vmem:[%s7142_s3 + $0x898] sm:$0xff] }
 0x795   : > { %4984 = vmatpush3.msra.mxu1 %v4502_v22  ;;  %v4527_v22 = vld [vmem:[%s7142_s3 + $0x818] sm:$0xff] }
 0x796   : > { %4985 = vmatprep.subr.mxu1 %v4517_v23  ;;  %v4542_v23 = vld [vmem:[%s7142_s3 + $0x890] sm:$0xff] }
 0x797   : > { %4986 = vmatpush3.msra.mxu1 %v4501_v24  ;;  %v4526_v24 = vld [vmem:[%s7142_s3 + $0x810] sm:$0xff] }
 0x798   : > { %4987 = vmatprep.subr.mxu1 %v4516_v25  ;;  %v4541_v25 = vld [vmem:[%s7142_s3 + $0x888] sm:$0xff] }
 0x799   : > { %4988 = vmatpush3.msra.mxu1 %v4500_v26  ;;  %v4525_v26 = vld [vmem:[%s7142_s3 + $0x808] sm:$0xff] }
 0x79a   : > { %4989 = vmatprep.subr.mxu1 %v4515_v27  ;;  %v4540_v27 = vld [vmem:[%s7142_s3 + $0x880] sm:$0xff] }
 0x79b   : > { %4990 = vmatpush3.msra.mxu1 %v4499_v28  ;;  %v4524_v28 = vld [vmem:[%s7142_s3 + $0x800] sm:$0xff] }
 0x79c   : > { %4991 = vmatprep.subr.mxu1 %v4514_v29  ;;  %v4556_v29 = vld [vmem:[%s7143_s4 + $0x80] sm:$0xff] }
 0x79d   : > { %4992 = vmatpush3.msra.mxu1 %v4498_v30 }
 0x79e   : > { %4993 = vmatprep.subr.mxu1 %v4513_v31 }
 0x79f   : > { %4994 = vmatpush3.msra.mxu1 %v4497_v32 }
 0x7a0   : > { %4995 = vmatprep.subr.mxu1 %v4512_v33 }
 0x7a1   : > { %4996 = vmatpush3.msra.mxu1 %v4496_v34 }
 0x7a2   : > { %4997 = vmatprep.subr.mxu1 %v4511_v35 }
 0x7a3   : > { %4998 = vmatpush3.msra.mxu1 %v4495_v36 }
 0x7a4   : > { %4999 = vmatprep.subr.mxu1 %v4510_v37  ;;  %v4557_v37 = vld [vmem:[%s7143_s4 + $0x88] sm:$0xff] }
 0x7a5   : > { %5000 = vmatpush3.msra.mxu1 %v4494_v38 }
 0x7a6   : > { %5001 = vmatprep.subr.mxu1 %v4509_v39 }
 0x7a7   : > { %5002 = vmatpush3.msra.mxu1 %v4493_v40 }
 0x7a8   : > { %5003 = vmatprep.subr.mxu1 %v4508_v41 }
 0x7a9   : > { %5004 = vmatpush3.msra.mxu1 %v4492_v42 }
 0x7aa   : > { %5005 = vmatprep.subr.mxu1 %v4507_v43 }
 0x7ab   : > { %5006 = vmatpush3.msra.mxu1 %v4491_v44 }
 0x7ac   : > { %5007 = vmatprep.subr.mxu1 %v4506_v45 }
 0x7ad   : > { %5008 = vmatpush3.msra.mxu1 %v4490_v46 }
 0x7ae   : > { %5009 = vmatprep.subr.mxu1 %v4505_v47  ;;  %v2343_v47 = vld [vmem:[%s7145_s6 + $0x38] sm:$0xff] }
 0x7af   : > { %5010 = vmatpush3.msra.mxu1 %v4489_v48  ;;  %v4569_v48 = vld [vmem:[%s7145_s6 + $0x78] sm:$0xff] }
 0x7b0   : > { %5011 = vmatprep.subr.mxu1 %v4504_v49  ;;  %v2342_v49 = vld [vmem:[%s7145_s6 + $0x30] sm:$0xff] }
 0x7b1   : > { %5012 = vmatpush3.msra.mxu1 %v4488_v50  ;;  %v4568_v50 = vld [vmem:[%s7145_s6 + $0x70] sm:$0xff] }
 0x7b2   : > { %2007 = vmatmul.mubr.f32.vlgmr.msra.gmra.mxu1 %v5778_v17 }
 0x7b3   : > { %5243 = vmatprep.mubr.msk.f32.mxu1 %vm801_vm1, %v4556_v29 }
 0x852   : > { %v5235_v52 = vpop.f32.mrf.mxu1 }
 0x853   : > { %v6556_v53 = vadd.f32 %v5235_v52, %v6444_v10  ;;  %v4532_v10 = vld [vmem:[%s7142_s3 + $0x840] sm:$0xff]  ;;  %v4567_v52 = vld [vmem:[%s7145_s6 + $0x68] sm:$0xff] }
 0x854   : > { %v1898_v54 = vpop.f32.mrf.mxu1 }
 0x855   : > { %v6559_v55 = vadd.f32 %v1898_v54, %v6447_v12  ;;  %v4531_v12 = vld [vmem:[%s7142_s3 + $0x838] sm:$0xff]  ;;  %v4566_v54 = vld [vmem:[%s7145_s6 + $0x60] sm:$0xff] }
 0x872   : > { %v5013_v56 = vpop.f32.mrf.mxu1 }
 0x874   : > { %v5014_v57 = vpop.f32.mrf.mxu1 }
 0x875   : > { %v5015_v58 = vadd.f32 %v5014_v57, %v5013_v56 }
 0x877   : > { %5236 = vmatprep.subr.mxu0 %v5015_v58 }
 0x878   : > { %5237 = vmatpush3.msra.mxu0 %v5015_v58 }
 0x879   : > { %5239 = vmatmul.mubr.msk.f32.vlgmr.msra.gmra.mxu0 %vm801_vm1, %v4521_v59  ;;  %5019 = vmatprep.subr.mxu0 %v4555_v60 }
 0x87a   : > { %5020 = vmatpush3.msra.mxu0 %v4539_v61  ;;  %2195 = vmatprep.mubr.f32.mxu0 %v5780_v18  ;;  %v4551_v18 = vld [vmem:[%s7142_s3 + $0x8d8] sm:$0xff] }
 0x87b   : > { %5021 = vmatprep.subr.mxu0 %v4554_v62 }
 0x87c   : > { %5022 = vmatpush3.msra.mxu0 %v4538_v63 }
 0x87d   : > { %5023 = vmatprep.subr.mxu0 %v4553_v0 }
 0x87e   : > { %5024 = vmatpush3.msra.mxu0 %v4537_v1 }
 0x87f   : > { %5025 = vmatprep.subr.mxu0 %v4552_v2 }
 0x880   : > { %5026 = vmatpush3.msra.mxu0 %v4536_v3 }
 0x881   : > { %5027 = vmatprep.subr.mxu0 %v4551_v18 }
 0x882   : > { %5028 = vmatpush3.msra.mxu0 %v4535_v4 }
 0x883   : > { %5029 = vmatprep.subr.mxu0 %v4550_v5 }
 0x884   : > { %5030 = vmatpush3.msra.mxu0 %v4534_v6  ;;  %v2287_v6 = vld [vmem:[%s379_s25] sm:$0xff] }
 0x885   : > { %5031 = vmatprep.subr.mxu0 %v4549_v7  ;;  %v2339_v7 = vld [vmem:[%s7145_s6 + $0x18] sm:$0xff] }
 0x886   : > { %5032 = vmatpush3.msra.mxu0 %v4533_v8  ;;  %v4565_v8 = vld [vmem:[%s7145_s6 + $0x58] sm:$0xff] }
 0x887   : > { %5033 = vmatprep.subr.mxu0 %v4548_v9 }
 0x888   : > { %5034 = vmatpush3.msra.mxu0 %v4532_v10  ;;  %v2338_v10 = vld [vmem:[%s7145_s6 + $0x10] sm:$0xff] }
 0x889   : > { %5035 = vmatprep.subr.mxu0 %v4547_v11  ;;  %v4564_v11 = vld [vmem:[%s7145_s6 + $0x50] sm:$0xff] }
 0x88a   : > { %5036 = vmatpush3.msra.mxu0 %v4531_v12 }
 0x88b   : > { %5037 = vmatprep.subr.mxu0 %v4546_v13  ;;  %v2288_v13 = vld [vmem:[%s379_s25 + $0x8] sm:$0xff] }
 0x88c   : > { %5038 = vmatpush3.msra.mxu0 %v4530_v14  ;;  %v2337_v14 = vld [vmem:[%s7145_s6 + $0x8] sm:$0xff] }
 0x88d   : > { %5039 = vmatprep.subr.mxu0 %v4545_v15  ;;  %v4563_v15 = vld [vmem:[%s7145_s6 + $0x48] sm:$0xff] }
 0x88e   : > { %5040 = vmatpush3.msra.mxu0 %v4529_v16 }
 0x88f   : > { %5041 = vmatprep.subr.mxu0 %v4544_v19  ;;  %v2336_v19 = vld [vmem:[%s7145_s6] sm:$0xff] }
 0x890   : > { %5042 = vmatpush3.msra.mxu0 %v4528_v20  ;;  %v4562_v20 = vld [vmem:[%s7145_s6 + $0x40] sm:$0xff] }
 0x891   : > { %5043 = vmatprep.subr.mxu0 %v4543_v21 }
 0x892   : > { %5044 = vmatpush3.msra.mxu0 %v4527_v22 }
 0x893   : > { %5045 = vmatprep.subr.mxu0 %v4542_v23 }
 0x894   : > { %5046 = vmatpush3.msra.mxu0 %v4526_v24 }
 0x895   : > { %5047 = vmatprep.subr.mxu0 %v4541_v25 }
 0x896   : > { %5048 = vmatpush3.msra.mxu0 %v4525_v26 }
 0x897   : > { %5049 = vmatprep.subr.mxu0 %v4540_v27 }
 0x898   : > { %5050 = vmatpush3.msra.mxu0 %v4524_v28 }
 0x899   : > { %2196 = vmatmul.mubr.f32.vlgmr.msra.gmra.mxu0 %v5778_v17  ;;  %5265 = vmatprep.subr.mxu0 %v4569_v48 }
 0x89a   : > { %5266 = vmatpush3.msra.mxu0 %v4569_v48  ;;  %v4584_v48 = vld [vmem:[%s7145_s6 + $0x80] sm:$0xff] }
 0x89b   : > { %5267 = vmatprep.subr.mxu0 %v4568_v50 }
 0x89c   : > { %5268 = vmatpush3.msra.mxu0 %v4568_v50 }
 0x89d   : > { %5269 = vmatprep.subr.mxu0 %v4567_v52 }
 0x89e   : > { %5270 = vmatpush3.msra.mxu0 %v4567_v52 }
 0x89f   : > { %5271 = vmatprep.subr.mxu0 %v4566_v54 }
 0x8a0   : > { %5272 = vmatpush3.msra.mxu0 %v4566_v54 }
 0x8a1   : > { %5273 = vmatprep.subr.mxu0 %v4565_v8 }
 0x8a2   : > { %5274 = vmatpush3.msra.mxu0 %v4565_v8  ;;  %v4603_v8 = vld [vmem:[%s7145_s6 + $0xc8] sm:$0xff] }
 0x8a3   : > { %5275 = vmatprep.subr.mxu0 %v4564_v11 }
 0x8a4   : > { %5276 = vmatpush3.msra.mxu0 %v4564_v11 }
 0x8a5   : > { %5277 = vmatprep.subr.mxu0 %v4563_v15 }
 0x8a6   : > { %5278 = vmatpush3.msra.mxu0 %v4563_v15 }
 0x8a7   : > { %5279 = vmatprep.subr.mxu0 %v4562_v20 }
 0x8a8   : > { %5280 = vmatpush3.msra.mxu0 %v4562_v20 }
 0x939   : > { %v5240_v30 = vpop.f32.mrf.mxu0 }
 0x93a   : > { %v2097_v31 = vadd.f32 %v5240_v30, %v6556_v53  ;;  %v2340_v53 = vld [vmem:[%s7145_s6 + $0x20] sm:$0xff] }
 0x93b   : > { %v2087_v32 = vpop.f32.mrf.mxu0  ;;  %v4572_v30 = vld [vmem:[%s7146_s7 + $0x20] sm:$0xff] }
 0x93c   : > { %v2096_v33 = vadd.f32 %v2087_v32, %v6559_v55 }
 0x959   : > { %v5051_v34 = vpop.f32.mrf.mxu0 }
 0x95b   : > { %v5052_v35 = vpop.f32.mrf.mxu0 }
 0x95c   : > { %v5053_v36 = vadd.f32 %v5052_v35, %v5051_v34  ;;  %v4573_v34 = vld [vmem:[%s7146_s7 + $0x28] sm:$0xff]  ;;  %v4574_v35 = vld [vmem:[%s7146_s7 + $0x30] sm:$0xff] }
 0x95e   : > { %5241 = vmatprep.subr.mxu1 %v5053_v36 }
 0x95f   : > { %5242 = vmatpush3.msra.mxu1 %v5053_v36 }
 0x960   : > { %5244 = vmatmul.mubr.msk.f32.vlgmr.msra.gmra.mxu1 %vm801_vm1, %v4557_v37  ;;  %5246 = vmatprep.subr.mxu1 %v2343_v47  ;;  %v4575_v37 = vld [vmem:[%s7146_s7 + $0x38] sm:$0xff] }
 0x961   : > { %5247 = vmatpush3.msra.mxu1 %v2343_v47  ;;  %v4585_v47 = vld [vmem:[%s7145_s6 + $0x88] sm:$0xff] }
 0x962   : > { %5248 = vmatprep.subr.mxu1 %v2342_v49 }
 0x963   : > { %5249 = vmatpush3.msra.mxu1 %v2342_v49  ;;  %v4594_v49 = vld [vmem:[%s7146_s7 + $0x40] sm:$0xff] }
 0x964   : > { %5250 = vmatprep.subr.mxu1 %v2341_v51 }
 0x965   : > { %5251 = vmatpush3.msra.mxu1 %v2341_v51 }
 0x966   : > { %5252 = vmatprep.subr.mxu1 %v2340_v53 }
 0x967   : > { %5253 = vmatpush3.msra.mxu1 %v2340_v53 }
 0x968   : > { %5254 = vmatprep.subr.mxu1 %v2339_v7 }
 0x969   : > { %5255 = vmatpush3.msra.mxu1 %v2339_v7  ;;  %v4604_v7 = vld [vmem:[%s7145_s6 + $0xd0] sm:$0xff] }
 0x96a   : > { %5256 = vmatprep.subr.mxu1 %v2338_v10 }
 0x96b   : > { %5257 = vmatpush3.msra.mxu1 %v2338_v10  ;;  %v4612_v10 = vld [vmem:[%s7146_s7 + $0x60] sm:$0xff] }
 0x96c   : > { %5258 = vmatprep.subr.mxu1 %v2337_v14 }
 0x96d   : > { %5259 = vmatpush3.msra.mxu1 %v2337_v14 }
 0x96e   : > { %5260 = vmatprep.subr.mxu1 %v2336_v19 }
 0x96f   : > { %5261 = vmatpush3.msra.mxu1 %v2336_v19 }
 0xa20   : > { %v5245_v17 = vpop.f32.mrf.mxu1 }
 0xa21   : > { %v6673_v38 = vadd.f32 %v5245_v17, %v2097_v31  ;;  %v4591_v17 = vld [vmem:[%s7145_s6 + $0xb8] sm:$0xff] }
 0xa22   : > { %v2276_v39 = vpop.f32.mrf.mxu1 }
 0xa23   : > { %v6675_v40 = vadd.f32 %v2276_v39, %v2096_v33  ;;  %v2293_v41 = vsel %vm2289_vm2, %v6673_v38, 0.0  ;;  %v2297_v45 = vmul.f32 %v6673_v38, %v6673_v38  ;;  %v2426_v39 = vld [vmem:[%s7146_s7 + $0x8] sm:$0xff] }
 0xa24   : > { %2294 = vadd.xlane.f32.xlu0 %v2293_v41  ;;  %v4590_v41 = vld [vmem:[%s7145_s6 + $0xb0] sm:$0xff] }
 0xa25   : > { %v2290_v42 = vsel %vm2289_vm2, %v6675_v40, 0.0  ;;  %v2296_v43 = vmul.f32 %v6675_v40, %v6675_v40  ;;  %v2301_v46 = vsel %vm2289_vm2, %v2297_v45, 0.0  ;;  %v4587_v45 = vld [vmem:[%s7145_s6 + $0x98] sm:$0xff] }
 0xa26   : > { %2291 = vadd.xlane.f32.xlu1 %v2290_v42  ;;  %v4589_v42 = vld [vmem:[%s7145_s6 + $0xa8] sm:$0xff] }
 0xa27   : > { %v2298_v44 = vsel %vm2289_vm2, %v2296_v43, 0.0  ;;  %v2428_v43 = vld [vmem:[%s7146_s7 + $0x18] sm:$0xff] }
 0xa28   : > { %2299 = vadd.xlane.f32.xlu0 %v2298_v44  ;;  %v4588_v44 = vld [vmem:[%s7145_s6 + $0xa0] sm:$0xff] }
 0xa2c   : > { %2302 = vadd.xlane.f32.xlu0 %v2301_v46  ;;  %v4586_v46 = vld [vmem:[%s7145_s6 + $0x90] sm:$0xff] }
 0xaad   : > { %v2295_v55 = vpop.xlane.xlu0 %2294 }
 0xaae   : > { %v2305_v59 = vmul.f32 0.015625, %v2295_v55 }
 0xaaf   : > { %v2292_v56 = vpop.xlane.xlu1 %2291 }
 0xab0   : > { %v2304_v57 = vmul.f32 0.015625, %v2292_v56  ;;  %v2309_v0 = vmul.f32 %v2305_v59, %v2305_v59  ;;  %v2321_v26 = vsub.f32 %v6673_v38, %v2305_v59  ;;  %v2425_v38 = vld [vmem:[%s7146_s7] sm:$0xff] }
 0xab1   : > { %v2300_v58 = vpop.xlane.xlu0 %2299 }
 0xab2   : > { %v2308_v60 = vmul.f32 %v2304_v57, %v2304_v57  ;;  %v2306_v61 = vmul.f32 0.015625, %v2300_v58  ;;  %v2320_v22 = vsub.f32 %v6675_v40, %v2304_v57  ;;  %v2427_v40 = vld [vmem:[%s7146_s7 + $0x10] sm:$0xff] }
 0xab4   : > { %v2310_v62 = vsub.f32 %v2306_v61, %v2308_v60 }
 0xab5   : > { %v2303_v63 = vpop.xlane.xlu0 %2302 }
 0xab6   : > { %v2312_v1 = vmax.f32 %v2310_v62, 0.0  ;;  %v2307_v2 = vmul.f32 0.015625, %v2303_v63 }
 0xab8   : > { %v2314_v3 = vadd.f32 1e-05, %v2312_v1  ;;  %v2311_v18 = vsub.f32 %v2307_v2, %v2309_v0  ;;  %v4595_v0 = vld [vmem:[%s7146_s7 + $0x48] sm:$0xff]  ;;  %v4609_v1 = vld [vmem:[%s7145_s6 + $0xf8] sm:$0xff]  ;;  %v4596_v2 = vld [vmem:[%s7146_s7 + $0x50] sm:$0xff] }
 0xaba   : > { %5553 = vrsqrt.f32 %v2314_v3  ;;  %v2313_v4 = vmax.f32 %v2311_v18, 0.0  ;;  %v4608_v3 = vld [vmem:[%s7145_s6 + $0xf0] sm:$0xff]  ;;  %v4597_v18 = vld [vmem:[%s7146_s7 + $0x58] sm:$0xff] }
 0xabc   : > { %v2315_v5 = vadd.f32 1e-05, %v2313_v4  ;;  %v4607_v4 = vld [vmem:[%s7145_s6 + $0xe8] sm:$0xff] }
 0xabe   : > { %5555 = vrsqrt.f32 %v2315_v5  ;;  %v4606_v5 = vld [vmem:[%s7145_s6 + $0xe0] sm:$0xff] }
 0xac7   : > { %v5554_v9 = vpop.eup %5553 }
 0xac8   : > { %v2318_v12 = vmul.f32 %v5554_v9, %v2287_v6  ;;  %v4605_v6 = vld [vmem:[%s7145_s6 + $0xd8] sm:$0xff]  ;;  %v4602_v9 = vld [vmem:[%s7145_s6 + $0xc0] sm:$0xff] }
 0xaca   : > { %2324 = vperm.xlu0 %5518, %v2318_v12  }
 0xacb   : > { %v5556_v16 = vpop.eup %5555 }
 0xacc   : > { %v2319_v21 = vmul.f32 %v5556_v16, %v2288_v13 }
 0xace   : > { %2329 = vperm.xlu1 %5517, %v2319_v21  }
 0xb45   : > { %v2325_v23 = vpop.permute.xlu0 %2324 }
 0xb46   : > { %v2332_v24 = vmul.f32 %v2325_v23, %v2320_v22  ;;  %v4613_v23 = vld [vmem:[%s7146_s7 + $0x68] sm:$0xff] }
 0xb48   : > { %v6740_v25 = vmax.f32 %v2332_v24, 0.0  ;;  %v4627_v24 = vld [vmem:[%s7145_s6 + $0x138] sm:$0xff] }
 0xb49   : > { %v2330_v27 = vpop.permute.xlu1 %2329 }
 0xb4a   : > { %v2333_v28 = vmul.f32 %v2330_v27, %v2321_v26  ;;  %5262 = vmatprep.mubr.msk.f32.mxu1 %vm2289_vm2, %v6740_v25  ;;  %5281 = vmatprep.mubr.msk.f32.mxu0 %vm2289_vm2, %v6740_v25  ;;  %v4614_v26 = vld [vmem:[%s7146_s7 + $0x70] sm:$0xff] }
 0xb4b   : > { %v4626_v27 = vld [vmem:[%s7145_s6 + $0x130] sm:$0xff] }
 0xb4c   : > { %v6747_v29 = vmax.f32 %v2333_v28, 0.0  ;;  %v4615_v28 = vld [vmem:[%s7146_s7 + $0x78] sm:$0xff] }
 0xb4e   : > { %5263 = vmatmul.mubr.msk.f32.vlgmr.msra.gmra.mxu1 %vm2289_vm2, %v6747_v29  ;;  %5282 = vmatmul.mubr.msk.f32.vlgmr.msra.gmra.mxu0 %vm2289_vm2, %v6747_v29 }
 0xb4f   : > { %5288 = vmatprep.mubr.msk.f32.mxu1 %vm2518_vm3, %v4572_v30  ;;  %5327 = vmatprep.mubr.msk.f32.mxu0 %vm2518_vm3, %v4594_v49  ;;  %v4625_v30 = vld [vmem:[%s7145_s6 + $0x128] sm:$0xff]  ;;  %v4644_v49 = vld [vmem:[%s7145_s6 + $0x170] sm:$0xff] }
 0xc0e   : > { %v5283_v31 = vpop.f32.mrf.mxu0  ;;  %v5264_v32 = vpop.f32.mrf.mxu1 }
 0xc0f   : > { %5284 = vmatprep.subr.mxu1 %v5283_v31 }
 0xc10   : > { %v2504_v33 = vpop.f32.mrf.mxu0  ;;  %5285 = vmatpush3.msra.mxu1 %v5283_v31  ;;  %v2416_v36 = vpop.f32.mrf.mxu1  ;;  %v4624_v31 = vld [vmem:[%s7145_s6 + $0x120] sm:$0xff] }
 0xc11   : > { %5286 = vmatprep.subr.mxu1 %v2504_v33 }
 0xc12   : > { %5287 = vmatpush3.msra.mxu1 %v2504_v33  ;;  %v4622_v33 = vld [vmem:[%s7145_s6 + $0x110] sm:$0xff] }
 0xc13   : > { %5289 = vmatmul.mubr.msk.f32.vlgmr.msra.gmra.mxu1 %vm2518_vm3, %v4573_v34  ;;  %5294 = vmatprep.subr.mxu1 %v5264_v32  ;;  %v4621_v34 = vld [vmem:[%s7145_s6 + $0x108] sm:$0xff] }
 0xc14   : > { %5295 = vmatpush3.msra.mxu1 %v5264_v32  ;;  %5291 = vmatprep.mubr.msk.f32.mxu1 %vm2518_vm3, %v4574_v35  ;;  %v4623_v32 = vld [vmem:[%s7145_s6 + $0x118] sm:$0xff]  ;;  %v4620_v35 = vld [vmem:[%s7145_s6 + $0x100] sm:$0xff] }
 0xc15   : > { %5296 = vmatprep.subr.mxu1 %v2416_v36 }
 0xc16   : > { %5297 = vmatpush3.msra.mxu1 %v2416_v36  ;;  %v4630_v36 = vld [vmem:[%s7146_s7 + $0x80] sm:$0xff] }
 0xc17   : > { %5292 = vmatmul.mubr.msk.f32.gmra.mxu1 %vm2518_vm3, %v4575_v37  ;;  %5304 = vmatprep.subr.mxu1 %v4591_v17 }
 0xc18   : > { %5298 = vmatprep.mubr.msk.f32.mxu1 %vm2518_vm3, %v2425_v38 }
 0xc1b   : > { %5299 = vmatmul.mubr.msk.f32.vlgmr.msra.gmra.mxu1 %vm2518_vm3, %v2426_v39 }
 0xc1c   : > { %5305 = vmatpush3.msra.mxu1 %v4591_v17  ;;  %5301 = vmatprep.mubr.msk.f32.mxu1 %vm2518_vm3, %v2427_v40 }
 0xc1d   : > { %5306 = vmatprep.subr.mxu1 %v4590_v41 }
 0xc1e   : > { %5307 = vmatpush3.msra.mxu1 %v4590_v41 }
 0xc1f   : > { %5308 = vmatprep.subr.mxu1 %v4589_v42  ;;  %5302 = vmatmul.mubr.msk.f32.gmra.mxu1 %vm2518_vm3, %v2428_v43 }
 0xc20   : > { %5309 = vmatpush3.msra.mxu1 %v4589_v42  ;;  %5320 = vmatprep.mubr.msk.f32.mxu1 %vm2289_vm2, %v6740_v25 }
 0xc21   : > { %5310 = vmatprep.subr.mxu1 %v4588_v44 }
 0xc22   : > { %5311 = vmatpush3.msra.mxu1 %v4588_v44 }
 0xc23   : > { %5312 = vmatprep.subr.mxu1 %v4587_v45 }
 0xc24   : > { %5313 = vmatpush3.msra.mxu1 %v4587_v45 }
 0xc25   : > { %5314 = vmatprep.subr.mxu1 %v4586_v46 }
 0xc26   : > { %5315 = vmatpush3.msra.mxu1 %v4586_v46  ;;  %v4631_v46 = vld [vmem:[%s7146_s7 + $0x88] sm:$0xff] }
 0xc27   : > { %5316 = vmatprep.subr.mxu1 %v4585_v47 }
 0xc28   : > { %5317 = vmatpush3.msra.mxu1 %v4585_v47  ;;  %v4645_v47 = vld [vmem:[%s7145_s6 + $0x178] sm:$0xff] }
 0xc29   : > { %5318 = vmatprep.subr.mxu1 %v4584_v48 }
 0xc2a   : > { %5319 = vmatpush3.msra.mxu1 %v4584_v48  ;;  %v4632_v48 = vld [vmem:[%s7146_s7 + $0x90] sm:$0xff] }
 0xc2b   : > { %5321 = vmatmul.mubr.msk.f32.vlgmr.msra.gmra.mxu1 %vm2289_vm2, %v6747_v29 }
 0xc2c   : > { %5356 = vmatprep.mubr.msk.f32.mxu1 %vm2518_vm3, %v4612_v10  ;;  %v4659_v10 = vld [vmem:[%s7145_s6 + $0x198] sm:$0xff] }
 0xcd3   : > { %v5290_v50 = vpop.f32.mrf.mxu1 }
 0xcd5   : > { %v2597_v51 = vpop.f32.mrf.mxu1 }
 0xcd7   : > { %v5293_v52 = vpop.f32.mrf.mxu1 }
 0xcd9   : > { %v2607_v53 = vpop.f32.mrf.mxu1 }
 0xcdb   : > { %v5300_v54 = vpop.f32.mrf.mxu1 }
 0xcdc   : > { %v2700_v55 = vadd.f32 %v5300_v54, %v5290_v50  ;;  %v4633_v50 = vld [vmem:[%s7146_s7 + $0x98] sm:$0xff]  ;;  %v4640_v54 = vld [vmem:[%s7145_s6 + $0x150] sm:$0xff] }
 0xcdd   : > { %v2694_v56 = vpop.f32.mrf.mxu1 }
 0xcde   : > { %v2695_v57 = vadd.f32 %v2694_v56, %v2597_v51  ;;  %v4643_v51 = vld [vmem:[%s7145_s6 + $0x168] sm:$0xff]  ;;  %v4638_v56 = vld [vmem:[%s7145_s6 + $0x140] sm:$0xff] }
 0xcdf   : > { %v5303_v58 = vpop.f32.mrf.mxu1 }
 0xce0   : > { %v2710_v59 = vadd.f32 %v5303_v58, %v5293_v52  ;;  %v4642_v52 = vld [vmem:[%s7145_s6 + $0x160] sm:$0xff] }
 0xce1   : > { %v2704_v60 = vpop.f32.mrf.mxu1 }
 0xce2   : > { %v2705_v61 = vadd.f32 %v2704_v60, %v2607_v53  ;;  %v4641_v53 = vld [vmem:[%s7145_s6 + $0x158] sm:$0xff] }
 0xceb   : > { %v5322_v62 = vpop.f32.mrf.mxu1 }
 0xcec   : > { %5323 = vmatprep.subr.mxu0 %v5322_v62 }
 0xced   : > { %v2788_v63 = vpop.f32.mrf.mxu1  ;;  %5324 = vmatpush3.msra.mxu0 %v5322_v62 }
 0xcee   : > { %5325 = vmatprep.subr.mxu0 %v2788_v63 }
 0xcef   : > { %5326 = vmatpush3.msra.mxu0 %v2788_v63 }
 0xcf0   : > { %5328 = vmatmul.mubr.msk.f32.vlgmr.msra.gmra.mxu0 %vm2518_vm3, %v4595_v0  ;;  %5333 = vmatprep.subr.mxu0 %v4609_v1 }
 0xcf1   : > { %5334 = vmatpush3.msra.mxu0 %v4609_v1  ;;  %5330 = vmatprep.mubr.msk.f32.mxu0 %vm2518_vm3, %v4596_v2 }
 0xcf2   : > { %5335 = vmatprep.subr.mxu0 %v4608_v3 }
 0xcf3   : > { %5336 = vmatpush3.msra.mxu0 %v4608_v3 }
 0xcf4   : > { %5331 = vmatmul.mubr.msk.f32.gmra.mxu0 %vm2518_vm3, %v4597_v18  ;;  %5337 = vmatprep.subr.mxu0 %v4607_v4  ;;  %v4649_v18 = vld [vmem:[%s7146_s7 + $0xa8] sm:$0xff] }
 0xcf5   : > { %5338 = vmatpush3.msra.mxu0 %v4607_v4  ;;  %5349 = vmatprep.mubr.msk.f32.mxu0 %vm2289_vm2, %v6740_v25  ;;  %v4663_v4 = vld [vmem:[%s7145_s6 + $0x1b8] sm:$0xff] }
 0xcf6   : > { %5339 = vmatprep.subr.mxu0 %v4606_v5 }
 0xcf7   : > { %5340 = vmatpush3.msra.mxu0 %v4606_v5  ;;  %v4650_v5 = vld [vmem:[%s7146_s7 + $0xb0] sm:$0xff] }
 0xcf8   : > { %5341 = vmatprep.subr.mxu0 %v4605_v6 }
 0xcf9   : > { %5342 = vmatpush3.msra.mxu0 %v4605_v6  ;;  %v4662_v6 = vld [vmem:[%s7145_s6 + $0x1b0] sm:$0xff] }
 0xcfa   : > { %5343 = vmatprep.subr.mxu0 %v4604_v7 }
 0xcfb   : > { %5344 = vmatpush3.msra.mxu0 %v4604_v7  ;;  %v4651_v7 = vld [vmem:[%s7146_s7 + $0xb8] sm:$0xff] }
 0xcfc   : > { %5345 = vmatprep.subr.mxu0 %v4603_v8 }
 0xcfd   : > { %5346 = vmatpush3.msra.mxu0 %v4603_v8  ;;  %v4661_v8 = vld [vmem:[%s7145_s6 + $0x1a8] sm:$0xff] }
 0xcfe   : > { %5347 = vmatprep.subr.mxu0 %v4602_v9 }
 0xcff   : > { %5348 = vmatpush3.msra.mxu0 %v4602_v9  ;;  %v4660_v9 = vld [vmem:[%s7145_s6 + $0x1a0] sm:$0xff] }
 0xd00   : > { %5350 = vmatmul.mubr.msk.f32.vlgmr.msra.gmra.mxu0 %vm2289_vm2, %v6747_v29 }
 0xd01   : > { %5385 = vmatprep.mubr.msk.f32.mxu0 %vm2518_vm3, %v4630_v36  ;;  %v4677_v36 = vld [vmem:[%s7145_s6 + $0x1d8] sm:$0xff] }
 0xdb0   : > { %v5329_v11 = vpop.f32.mrf.mxu0 }
 0xdb1   : > { %v2900_v12 = vadd.f32 %v5329_v11, %v2700_v55  ;;  %v4639_v55 = vld [vmem:[%s7145_s6 + $0x148] sm:$0xff]  ;;  %v4658_v11 = vld [vmem:[%s7145_s6 + $0x190] sm:$0xff] }
 0xdb2   : > { %v2880_v13 = vpop.f32.mrf.mxu0 }
 0xdb3   : > { %v2899_v14 = vadd.f32 %v2880_v13, %v2695_v57  ;;  %v4648_v57 = vld [vmem:[%s7146_s7 + $0xa0] sm:$0xff] }
 0xdb4   : > { %v5332_v15 = vpop.f32.mrf.mxu0  ;;  %v4656_v13 = vld [vmem:[%s7145_s6 + $0x180] sm:$0xff] }
 0xdb5   : > { %v2902_v16 = vadd.f32 %v5332_v15, %v2710_v59 }
 0xdb6   : > { %v2890_v19 = vpop.f32.mrf.mxu0 }
 0xdb7   : > { %v2901_v20 = vadd.f32 %v2890_v19, %v2705_v61 }
 0xdc0   : > { %v5351_v21 = vpop.f32.mrf.mxu0 }
 0xdc1   : > { %5352 = vmatprep.subr.mxu1 %v5351_v21 }
 0xdc2   : > { %v2978_v22 = vpop.f32.mrf.mxu0  ;;  %5353 = vmatpush3.msra.mxu1 %v5351_v21 }
 0xdc3   : > { %5354 = vmatprep.subr.mxu1 %v2978_v22 }
 0xdc4   : > { %5355 = vmatpush3.msra.mxu1 %v2978_v22 }
 0xdc5   : > { %5357 = vmatmul.mubr.msk.f32.vlgmr.msra.gmra.mxu1 %vm2518_vm3, %v4613_v23  ;;  %5362 = vmatprep.subr.mxu1 %v4627_v24 }
 0xdc6   : > { %5363 = vmatpush3.msra.mxu1 %v4627_v24  ;;  %5359 = vmatprep.mubr.msk.f32.mxu1 %vm2518_vm3, %v4614_v26 }
 0xdc7   : > { %5364 = vmatprep.subr.mxu1 %v4626_v27 }
 0xdc8   : > { %5365 = vmatpush3.msra.mxu1 %v4626_v27 }
 0xdc9   : > { %5360 = vmatmul.mubr.msk.f32.gmra.mxu1 %vm2518_vm3, %v4615_v28  ;;  %5366 = vmatprep.subr.mxu1 %v4625_v30  ;;  %v4667_v28 = vld [vmem:[%s7146_s7 + $0xc8] sm:$0xff] }
 0xdca   : > { %5367 = vmatpush3.msra.mxu1 %v4625_v30  ;;  %5378 = vmatprep.mubr.msk.f32.mxu1 %vm2289_vm2, %v6740_v25  ;;  %v4681_v30 = vld [vmem:[%s7145_s6 + $0x1f8] sm:$0xff] }
 0xdcb   : > { %5368 = vmatprep.subr.mxu1 %v4624_v31 }
 0xdcc   : > { %5369 = vmatpush3.msra.mxu1 %v4624_v31  ;;  %v4668_v31 = vld [vmem:[%s7146_s7 + $0xd0] sm:$0xff] }
 0xdcd   : > { %5370 = vmatprep.subr.mxu1 %v4623_v32 }
 0xdce   : > { %5371 = vmatpush3.msra.mxu1 %v4623_v32  ;;  %v4680_v32 = vld [vmem:[%s7145_s6 + $0x1f0] sm:$0xff] }
 0xdcf   : > { %5372 = vmatprep.subr.mxu1 %v4622_v33 }
 0xdd0   : > { %5373 = vmatpush3.msra.mxu1 %v4622_v33  ;;  %v4669_v33 = vld [vmem:[%s7146_s7 + $0xd8] sm:$0xff] }
 0xdd1   : > { %5374 = vmatprep.subr.mxu1 %v4621_v34 }
 0xdd2   : > { %5375 = vmatpush3.msra.mxu1 %v4621_v34  ;;  %v4679_v34 = vld [vmem:[%s7145_s6 + $0x1e8] sm:$0xff] }
 0xdd3   : > { %5376 = vmatprep.subr.mxu1 %v4620_v35 }
 0xdd4   : > { %5377 = vmatpush3.msra.mxu1 %v4620_v35  ;;  %v4678_v35 = vld [vmem:[%s7145_s6 + $0x1e0] sm:$0xff] }
 0xdd5   : > { %5379 = vmatmul.mubr.msk.f32.vlgmr.msra.gmra.mxu1 %vm2289_vm2, %v6747_v29 }
 0xdd6   : > { %5414 = vmatprep.mubr.msk.f32.mxu1 %vm2518_vm3, %v4648_v57  ;;  %v4695_v57 = vld [vmem:[%s7145_s6 + $0x218] sm:$0xff] }
 0xe85   : > { %v5358_v37 = vpop.f32.mrf.mxu1 }
 0xe86   : > { %v3090_v17 = vadd.f32 %v5358_v37, %v2900_v12  ;;  %v4657_v12 = vld [vmem:[%s7145_s6 + $0x188] sm:$0xff]  ;;  %v4676_v37 = vld [vmem:[%s7145_s6 + $0x1d0] sm:$0xff] }
 0xe87   : > { %v3070_v38 = vpop.f32.mrf.mxu1 }
 0xe88   : > { %v3089_v39 = vadd.f32 %v3070_v38, %v2899_v14  ;;  %v4666_v14 = vld [vmem:[%s7146_s7 + $0xc0] sm:$0xff] }
 0xe89   : > { %v5361_v40 = vpop.f32.mrf.mxu1  ;;  %v4674_v38 = vld [vmem:[%s7145_s6 + $0x1c0] sm:$0xff] }
 0xe8a   : > { %v3092_v41 = vadd.f32 %v5361_v40, %v2902_v16 }
 0xe8b   : > { %v3080_v42 = vpop.f32.mrf.mxu1 }
 0xe8c   : > { %v3091_v43 = vadd.f32 %v3080_v42, %v2901_v20 }
 0xe95   : > { %v5380_v44 = vpop.f32.mrf.mxu1 }
 0xe96   : > { %5381 = vmatprep.subr.mxu0 %v5380_v44 }
 0xe97   : > { %v3168_v45 = vpop.f32.mrf.mxu1  ;;  %5382 = vmatpush3.msra.mxu0 %v5380_v44 }
 0xe98   : > { %5383 = vmatprep.subr.mxu0 %v3168_v45 }
 0xe99   : > { %5384 = vmatpush3.msra.mxu0 %v3168_v45 }
 0xe9a   : > { %5386 = vmatmul.mubr.msk.f32.vlgmr.msra.gmra.mxu0 %vm2518_vm3, %v4631_v46  ;;  %5391 = vmatprep.subr.mxu0 %v4645_v47 }
 0xe9b   : > { %5392 = vmatpush3.msra.mxu0 %v4645_v47  ;;  %5388 = vmatprep.mubr.msk.f32.mxu0 %vm2518_vm3, %v4632_v48 }
 0xe9c   : > { %5393 = vmatprep.subr.mxu0 %v4644_v49 }
 0xe9d   : > { %5394 = vmatpush3.msra.mxu0 %v4644_v49 }
 0xe9e   : > { %5389 = vmatmul.mubr.msk.f32.gmra.mxu0 %vm2518_vm3, %v4633_v50  ;;  %5395 = vmatprep.subr.mxu0 %v4643_v51  ;;  %v4685_v50 = vld [vmem:[%s7146_s7 + $0xe8] sm:$0xff] }
 0xe9f   : > { %5396 = vmatpush3.msra.mxu0 %v4643_v51  ;;  %5407 = vmatprep.mubr.msk.f32.mxu0 %vm2289_vm2, %v6740_v25  ;;  %v4699_v51 = vld [vmem:[%s7145_s6 + $0x238] sm:$0xff] }
 0xea0   : > { %5397 = vmatprep.subr.mxu0 %v4642_v52 }
 0xea1   : > { %5398 = vmatpush3.msra.mxu0 %v4642_v52  ;;  %v4686_v52 = vld [vmem:[%s7146_s7 + $0xf0] sm:$0xff] }
 0xea2   : > { %5399 = vmatprep.subr.mxu0 %v4641_v53 }
 0xea3   : > { %5400 = vmatpush3.msra.mxu0 %v4641_v53  ;;  %v4698_v53 = vld [vmem:[%s7145_s6 + $0x230] sm:$0xff] }
 0xea4   : > { %5401 = vmatprep.subr.mxu0 %v4640_v54 }
 0xea5   : > { %5402 = vmatpush3.msra.mxu0 %v4640_v54  ;;  %v4687_v54 = vld [vmem:[%s7146_s7 + $0xf8] sm:$0xff] }
 0xea6   : > { %5403 = vmatprep.subr.mxu0 %v4639_v55 }
 0xea7   : > { %5404 = vmatpush3.msra.mxu0 %v4639_v55  ;;  %v4697_v55 = vld [vmem:[%s7145_s6 + $0x228] sm:$0xff] }
 0xea8   : > { %5405 = vmatprep.subr.mxu0 %v4638_v56 }
 0xea9   : > { %5406 = vmatpush3.msra.mxu0 %v4638_v56  ;;  %v4696_v56 = vld [vmem:[%s7145_s6 + $0x220] sm:$0xff] }
 0xeaa   : > { %5408 = vmatmul.mubr.msk.f32.vlgmr.msra.gmra.mxu0 %vm2289_vm2, %v6747_v29 }
 0xeab   : > { %5443 = vmatprep.mubr.msk.f32.mxu0 %vm2518_vm3, %v4666_v14 }
 0xf5a   : > { %v5387_v58 = vpop.f32.mrf.mxu0 }
 0xf5b   : > { %v3280_v59 = vadd.f32 %v5387_v58, %v3090_v17  ;;  %v4675_v17 = vld [vmem:[%s7145_s6 + $0x1c8] sm:$0xff]  ;;  %v4694_v58 = vld [vmem:[%s7145_s6 + $0x210] sm:$0xff] }
 0xf5c   : > { %v3260_v60 = vpop.f32.mrf.mxu0 }
 0xf5d   : > { %v3279_v61 = vadd.f32 %v3260_v60, %v3089_v39  ;;  %v4684_v39 = vld [vmem:[%s7146_s7 + $0xe0] sm:$0xff] }
 0xf5e   : > { %v5390_v62 = vpop.f32.mrf.mxu0  ;;  %v4702_v60 = vld [vmem:[%s7146_s7 + $0x100] sm:$0xff] }
 0xf5f   : > { %v3282_v63 = vadd.f32 %v5390_v62, %v3092_v41 }
 0xf60   : > { %v3270_v0 = vpop.f32.mrf.mxu0 }
 0xf61   : > { %v3281_v1 = vadd.f32 %v3270_v0, %v3091_v43 }
 0xf6a   : > { %v5409_v2 = vpop.f32.mrf.mxu0 }
 0xf6b   : > { %5410 = vmatprep.subr.mxu1 %v5409_v2 }
 0xf6c   : > { %v3358_v3 = vpop.f32.mrf.mxu0  ;;  %5411 = vmatpush3.msra.mxu1 %v5409_v2 }
 0xf6d   : > { %5412 = vmatprep.subr.mxu1 %v3358_v3 }
 0xf6e   : > { %5413 = vmatpush3.msra.mxu1 %v3358_v3 }
 0xf6f   : > { %5415 = vmatmul.mubr.msk.f32.vlgmr.msra.gmra.mxu1 %vm2518_vm3, %v4649_v18  ;;  %5420 = vmatprep.subr.mxu1 %v4663_v4 }
 0xf70   : > { %5421 = vmatpush3.msra.mxu1 %v4663_v4  ;;  %5417 = vmatprep.mubr.msk.f32.mxu1 %vm2518_vm3, %v4650_v5 }
 0xf71   : > { %5422 = vmatprep.subr.mxu1 %v4662_v6 }
 0xf72   : > { %5423 = vmatpush3.msra.mxu1 %v4662_v6  ;;  %v4704_v6 = vld [vmem:[%s7146_s7 + $0x110] sm:$0xff] }
 0xf73   : > { %5418 = vmatmul.mubr.msk.f32.gmra.mxu1 %vm2518_vm3, %v4651_v7  ;;  %5424 = vmatprep.subr.mxu1 %v4661_v8  ;;  %v4705_v7 = vld [vmem:[%s7146_s7 + $0x118] sm:$0xff] }
 0xf74   : > { %5425 = vmatpush3.msra.mxu1 %v4661_v8  ;;  %5436 = vmatprep.mubr.msk.f32.mxu1 %vm2289_vm2, %v6740_v25 }
 0xf75   : > { %5426 = vmatprep.subr.mxu1 %v4660_v9 }
 0xf76   : > { %5427 = vmatpush3.msra.mxu1 %v4660_v9 }
 0xf77   : > { %5428 = vmatprep.subr.mxu1 %v4659_v10 }
 0xf78   : > { %5429 = vmatpush3.msra.mxu1 %v4659_v10 }
 0xf79   : > { %5430 = vmatprep.subr.mxu1 %v4658_v11 }
 0xf7a   : > { %5431 = vmatpush3.msra.mxu1 %v4658_v11 }
 0xf7b   : > { %5432 = vmatprep.subr.mxu1 %v4657_v12 }
 0xf7c   : > { %5433 = vmatpush3.msra.mxu1 %v4657_v12 }
 0xf7d   : > { %5434 = vmatprep.subr.mxu1 %v4656_v13 }
 0xf7e   : > { %5435 = vmatpush3.msra.mxu1 %v4656_v13 }
 0xf7f   : > { %5437 = vmatmul.mubr.msk.f32.vlgmr.msra.gmra.mxu1 %vm2289_vm2, %v6747_v29 }
 0xf80   : > { %5472 = vmatprep.mubr.msk.f32.mxu1 %vm2518_vm3, %v4684_v39 }
0x102f   : > { %v5416_v15 = vpop.f32.mrf.mxu1 }
0x1030   : > { %v3470_v16 = vadd.f32 %v5416_v15, %v3280_v59  ;;  %v4693_v59 = vld [vmem:[%s7145_s6 + $0x208] sm:$0xff] }
0x1031   : > { %v3450_v19 = vpop.f32.mrf.mxu1 }
0x1032   : > { %v3469_v20 = vadd.f32 %v3450_v19, %v3279_v61 }
0x1033   : > { %v5419_v21 = vpop.f32.mrf.mxu1 }
0x1034   : > { %v3472_v22 = vadd.f32 %v5419_v21, %v3282_v63 }
0x1035   : > { %v3460_v23 = vpop.f32.mrf.mxu1 }
0x1036   : > { %v3471_v24 = vadd.f32 %v3460_v23, %v3281_v1 }
0x103f   : > { %v5438_v26 = vpop.f32.mrf.mxu1 }
0x1040   : > { %5439 = vmatprep.subr.mxu0 %v5438_v26 }
0x1041   : > { %v3548_v27 = vpop.f32.mrf.mxu1  ;;  %5440 = vmatpush3.msra.mxu0 %v5438_v26 }
0x1042   : > { %5441 = vmatprep.subr.mxu0 %v3548_v27 }
0x1043   : > { %5442 = vmatpush3.msra.mxu0 %v3548_v27 }
0x1044   : > { %5444 = vmatmul.mubr.msk.f32.vlgmr.msra.gmra.mxu0 %vm2518_vm3, %v4667_v28  ;;  %5449 = vmatprep.subr.mxu0 %v4681_v30 }
0x1045   : > { %5450 = vmatpush3.msra.mxu0 %v4681_v30  ;;  %5446 = vmatprep.mubr.msk.f32.mxu0 %vm2518_vm3, %v4668_v31 }
0x1046   : > { %5451 = vmatprep.subr.mxu0 %v4680_v32 }
0x1047   : > { %5452 = vmatpush3.msra.mxu0 %v4680_v32 }
0x1048   : > { %5447 = vmatmul.mubr.msk.f32.gmra.mxu0 %vm2518_vm3, %v4669_v33  ;;  %5453 = vmatprep.subr.mxu0 %v4679_v34 }
0x1049   : > { %5454 = vmatpush3.msra.mxu0 %v4679_v34  ;;  %5465 = vmatprep.mubr.msk.f32.mxu0 %vm2289_vm2, %v6740_v25 }
0x104a   : > { %5455 = vmatprep.subr.mxu0 %v4678_v35 }
0x104b   : > { %5456 = vmatpush3.msra.mxu0 %v4678_v35 }
0x104c   : > { %5457 = vmatprep.subr.mxu0 %v4677_v36 }
0x104d   : > { %5458 = vmatpush3.msra.mxu0 %v4677_v36 }
0x104e   : > { %5459 = vmatprep.subr.mxu0 %v4676_v37 }
0x104f   : > { %5460 = vmatpush3.msra.mxu0 %v4676_v37 }
0x1050   : > { %5461 = vmatprep.subr.mxu0 %v4675_v17 }
0x1051   : > { %5462 = vmatpush3.msra.mxu0 %v4675_v17 }
0x1052   : > { %5463 = vmatprep.subr.mxu0 %v4674_v38 }
0x1053   : > { %5464 = vmatpush3.msra.mxu0 %v4674_v38 }
0x1054   : > { %5466 = vmatmul.mubr.msk.f32.vlgmr.msra.gmra.mxu0 %vm2289_vm2, %v6747_v29 }
0x1055   : > { %5501 = vmatprep.mubr.msk.f32.mxu0 %vm2518_vm3, %v4702_v60 }
0x1104   : > { %v5445_v40 = vpop.f32.mrf.mxu0 }
0x1105   : > { %v3660_v41 = vadd.f32 %v5445_v40, %v3470_v16 }
0x1106   : > { %v3640_v42 = vpop.f32.mrf.mxu0 }
0x1107   : > { %v3659_v43 = vadd.f32 %v3640_v42, %v3469_v20 }
0x1108   : > { %v5448_v44 = vpop.f32.mrf.mxu0 }
0x1109   : > { %v3662_v45 = vadd.f32 %v5448_v44, %v3472_v22 }
0x110a   : > { %v3650_v46 = vpop.f32.mrf.mxu0 }
0x110b   : > { %v3661_v47 = vadd.f32 %v3650_v46, %v3471_v24 }
0x1114   : > { %v5467_v48 = vpop.f32.mrf.mxu0 }
0x1115   : > { %5468 = vmatprep.subr.mxu1 %v5467_v48 }
0x1116   : > { %v3738_v49 = vpop.f32.mrf.mxu0  ;;  %5469 = vmatpush3.msra.mxu1 %v5467_v48 }
0x1117   : > { %5470 = vmatprep.subr.mxu1 %v3738_v49 }
0x1118   : > { %5471 = vmatpush3.msra.mxu1 %v3738_v49 }
0x1119   : > { %5473 = vmatmul.mubr.msk.f32.vlgmr.msra.gmra.mxu1 %vm2518_vm3, %v4685_v50  ;;  %5478 = vmatprep.subr.mxu1 %v4699_v51 }
0x111a   : > { %5479 = vmatpush3.msra.mxu1 %v4699_v51  ;;  %5475 = vmatprep.mubr.msk.f32.mxu1 %vm2518_vm3, %v4686_v52 }
0x111b   : > { %5480 = vmatprep.subr.mxu1 %v4698_v53 }
0x111c   : > { %5481 = vmatpush3.msra.mxu1 %v4698_v53 }
0x111d   : > { %5476 = vmatmul.mubr.msk.f32.gmra.mxu1 %vm2518_vm3, %v4687_v54  ;;  %5482 = vmatprep.subr.mxu1 %v4697_v55 }
0x111e   : > { %5483 = vmatpush3.msra.mxu1 %v4697_v55  ;;  %5494 = vmatprep.mubr.msk.f32.mxu1 %vm2289_vm2, %v6740_v25  ;;  %v4692_v25 = vld [vmem:[%s7145_s6 + $0x200] sm:$0xff] }
0x111f   : > { %5484 = vmatprep.subr.mxu1 %v4696_v56 }
0x1120   : > { %5485 = vmatpush3.msra.mxu1 %v4696_v56 }
0x1121   : > { %5486 = vmatprep.subr.mxu1 %v4695_v57 }
0x1122   : > { %5487 = vmatpush3.msra.mxu1 %v4695_v57 }
0x1123   : > { %5488 = vmatprep.subr.mxu1 %v4694_v58 }
0x1124   : > { %5489 = vmatpush3.msra.mxu1 %v4694_v58 }
0x1125   : > { %5490 = vmatprep.subr.mxu1 %v4693_v59 }
0x1126   : > { %5491 = vmatpush3.msra.mxu1 %v4693_v59 }
0x1127   : > { %5492 = vmatprep.subr.mxu1 %v4692_v25 }
0x1128   : > { %5493 = vmatpush3.msra.mxu1 %v4692_v25 }
0x1129   : > { %5495 = vmatmul.mubr.msk.f32.vlgmr.msra.gmra.mxu1 %vm2289_vm2, %v6747_v29  ;;  %v4703_v29 = vld [vmem:[%s7146_s7 + $0x108] sm:$0xff] }
0x11d9   : > { %v5474_v61 = vpop.f32.mrf.mxu1 }
0x11da   : > { %v3850_v62 = vadd.f32 %v5474_v61, %v3660_v41 }
0x11db   : > { %v3830_v63 = vpop.f32.mrf.mxu1 }
0x11dc   : > { %v3849_v0 = vadd.f32 %v3830_v63, %v3659_v43 }
0x11dd   : > { %v5477_v1 = vpop.f32.mrf.mxu1 }
0x11de   : > { %v3852_v2 = vadd.f32 %v5477_v1, %v3662_v45 }
0x11df   : > { %v3840_v3 = vpop.f32.mrf.mxu1 }
0x11e0   : > { %v3851_v18 = vadd.f32 %v3840_v3, %v3661_v47 }
0x11e9   : > { %v5496_v4 = vpop.f32.mrf.mxu1 }
0x11ea   : > { %5497 = vmatprep.subr.mxu0 %v5496_v4 }
0x11eb   : > { %v3928_v5 = vpop.f32.mrf.mxu1  ;;  %5498 = vmatpush3.msra.mxu0 %v5496_v4 }
0x11ec   : > { %5499 = vmatprep.subr.mxu0 %v3928_v5 }
0x11ed   : > { %5500 = vmatpush3.msra.mxu0 %v3928_v5 }
0x11ee   : > { %5502 = vmatmul.mubr.msk.f32.vlgmr.msra.gmra.mxu0 %vm2518_vm3, %v4703_v29 }
0x11ef   : > { %5504 = vmatprep.mubr.msk.f32.mxu0 %vm2518_vm3, %v4704_v6  ;;  %v4046_v6 = vld [vmem:[%s384_s20 + $0x18] sm:$0xff] }
0x11f2   : > { %5505 = vmatmul.mubr.msk.f32.gmra.mxu0 %vm2518_vm3, %v4705_v7 }
0x12ae   : > { %v5503_v8 = vpop.f32.mrf.mxu0 }
0x12af   : > { %v7093_v9 = vadd.f32 %v5503_v8, %v3850_v62  ;;  %v4044_v62 = vld [vmem:[%s384_s20 + $0x8] sm:$0xff] }
0x12b0   : > { %v4020_v10 = vpop.f32.mrf.mxu0 }
0x12b1   : > { %v7095_v11 = vadd.f32 %v4020_v10, %v3849_v0  ;;  %v4050_v12 = vsel %vm2518_vm3, %v7093_v9, 0.0  ;;  %v4060_v13 = vmul.f32 %v7093_v9, %v7093_v9  ;;  %v4043_v0 = vld [vmem:[%s384_s20] sm:$0xff] }
0x12b2   : > { %4051 = vadd.xlane.f32.xlu0 %v4050_v12  ;;  %v5506_v14 = vpop.f32.mrf.mxu0 }
0x12b3   : > { %v4047_v15 = vsel %vm2518_vm3, %v7095_v11, 0.0  ;;  %v4059_v16 = vmul.f32 %v7095_v11, %v7095_v11  ;;  %v7105_v20 = vadd.f32 %v5506_v14, %v3852_v2  ;;  %v4066_v21 = vsel %vm2518_vm3, %v4060_v13, 0.0 }
0x12b4   : > { %v4030_v19 = vpop.f32.mrf.mxu0  ;;  %4048 = vadd.xlane.f32.xlu1 %v4047_v15 }
0x12b5   : > { %v7108_v22 = vadd.f32 %v4030_v19, %v3851_v18  ;;  %v4063_v23 = vsel %vm2518_vm3, %v4059_v16, 0.0  ;;  %v4056_v24 = vsel %vm2518_vm3, %v7105_v20, 0.0  ;;  %v4062_v26 = vmul.f32 %v7105_v20, %v7105_v20  ;;  %v4045_v18 = vld [vmem:[%s384_s20 + $0x10] sm:$0xff] }
0x12b6   : > { %4067 = vadd.xlane.f32.xlu0 %v4066_v21 }
0x12b7   : > { %v4053_v27 = vsel %vm2518_vm3, %v7108_v22, 0.0  ;;  %v4061_v28 = vmul.f32 %v7108_v22, %v7108_v22  ;;  %v4072_v30 = vsel %vm2518_vm3, %v4062_v26, 0.0 }
0x12b8   : > { %4064 = vadd.xlane.f32.xlu1 %v4063_v23 }
0x12b9   : > { %v4069_v31 = vsel %vm2518_vm3, %v4061_v28, 0.0 }
0x12ba   : > { %4057 = vadd.xlane.f32.xlu0 %v4056_v24 }
0x12bc   : > { %4054 = vadd.xlane.f32.xlu1 %v4053_v27 }
0x12be   : > { %4073 = vadd.xlane.f32.xlu0 %v4072_v30 }
0x12c0   : > { %4070 = vadd.xlane.f32.xlu1 %v4069_v31 }
0x133b   : > { %v4052_v32 = vpop.xlane.xlu0 %4051 }
0x133c   : > { %v4076_v33 = vmul.f32 0.0625, %v4052_v32 }
0x133d   : > { %v4049_v34 = vpop.xlane.xlu1 %4048 }
0x133e   : > { %v4075_v35 = vmul.f32 0.0625, %v4049_v34  ;;  %v4084_v37 = vmul.f32 %v4076_v33, %v4076_v33  ;;  %v4108_v8 = vsub.f32 %v7093_v9, %v4076_v33 }
0x133f   : > { %v4068_v36 = vpop.xlane.xlu0 %4067 }
0x1340   : > { %v4080_v17 = vmul.f32 0.0625, %v4068_v36  ;;  %v4083_v39 = vmul.f32 %v4075_v35, %v4075_v35  ;;  %v4107_v13 = vsub.f32 %v7095_v11, %v4075_v35 }
0x1341   : > { %v4065_v38 = vpop.xlane.xlu1 %4064 }
0x1342   : > { %v4088_v40 = vsub.f32 %v4080_v17, %v4084_v37  ;;  %v4079_v41 = vmul.f32 0.0625, %v4065_v38 }
0x1343   : > { %v4058_v42 = vpop.xlane.xlu0 %4057 }
0x1344   : > { %v4092_v43 = vmax.f32 %v4088_v40, 0.0  ;;  %v4087_v44 = vsub.f32 %v4079_v41, %v4083_v39  ;;  %v4078_v45 = vmul.f32 0.0625, %v4058_v42 }
0x1345   : > { %v4055_v46 = vpop.xlane.xlu1 %4054 }
0x1346   : > { %v4096_v47 = vadd.f32 1e-05, %v4092_v43  ;;  %v4091_v48 = vmax.f32 %v4087_v44, 0.0  ;;  %v4077_v49 = vmul.f32 0.0625, %v4055_v46  ;;  %v4086_v52 = vmul.f32 %v4078_v45, %v4078_v45 }
0x1347   : > { %v4074_v50 = vpop.xlane.xlu0 %4073  ;;  %v4110_v26 = vsub.f32 %v7105_v20, %v4078_v45 }
0x1348   : > { %5557 = vrsqrt.f32 %v4096_v47  ;;  %v4095_v51 = vadd.f32 1e-05, %v4091_v48  ;;  %v4082_v53 = vmul.f32 0.0625, %v4074_v50  ;;  %v4085_v55 = vmul.f32 %v4077_v49, %v4077_v49 }
0x1349   : > { %v4071_v54 = vpop.xlane.xlu1 %4070  ;;  %v4109_v21 = vsub.f32 %v7108_v22, %v4077_v49 }
0x134a   : > { %5559 = vrsqrt.f32 %v4095_v51  ;;  %v4090_v56 = vsub.f32 %v4082_v53, %v4086_v52  ;;  %v4081_v57 = vmul.f32 0.0625, %v4071_v54 }
0x134c   : > { %v4094_v58 = vmax.f32 %v4090_v56, 0.0  ;;  %v4089_v59 = vsub.f32 %v4081_v57, %v4085_v55 }
0x134e   : > { %v4093_v25 = vmax.f32 %v4089_v59, 0.0  ;;  %v4098_v60 = vadd.f32 1e-05, %v4094_v58 }
0x1350   : > { %v4097_v61 = vadd.f32 1e-05, %v4093_v25 }
0x1352   : > { %5561 = vrsqrt.f32 %v4097_v61 }
0x1353   : > { %5563 = vrsqrt.f32 %v4098_v60 }
0x1355   : > { %v5558_v63 = vpop.eup %5557 }
0x1356   : > { %v4104_v1 = vmul.f32 %v5558_v63, %v4044_v62 }
0x1357   : > { %v5560_v2 = vpop.eup %5559 }
0x1358   : > { %4118 = vperm.xlu0 %5518, %v4104_v1   ;;  %v4103_v3 = vmul.f32 %v5560_v2, %v4043_v0 }
0x135a   : > { %4113 = vperm.xlu1 %5517, %v4103_v3  }
0x135f   : > { %v5562_v4 = vpop.eup %5561 }
0x1360   : > { %v4105_v5 = vmul.f32 %v5562_v4, %v4045_v18  ;;  %v5564_v29 = vpop.eup %5563 }
0x1361   : > { %v4106_v7 = vmul.f32 %v5564_v29, %v4046_v6 }
0x1362   : > { %4123 = vperm.xlu1 %5517, %v4105_v5  }
0x1366   : > { %4128 = vperm.xlu1 %5517, %v4106_v7  }
0x13d3   : > { %v4119_v10 = vpop.permute.xlu0 %4118 }
0x13d4   : > { %v4132_v12 = vmul.f32 %v4119_v10, %v4108_v8 }
0x13d5   : > { %v4114_v14 = vpop.permute.xlu1 %4113 }
0x13d6   : > { %v4136_v15 = vmax.f32 %v4132_v12, 0.0  ;;  %v4131_v16 = vmul.f32 %v4114_v14, %v4107_v13 }
0x13d8   : > { %4140 = vst.msk [vmem:[%s389_s22 + $0x8] sm:$0xff] %vm2518_vm3, %v4136_v15  ;;  %v4135_v19 = vmax.f32 %v4131_v16, 0.0 }
0x13da   : > { %4139 = vst.msk [vmem:[%s389_s22] sm:$0xff] %vm2518_vm3, %v4135_v19 }
0x13dd   : > { %v4124_v23 = vpop.permute.xlu1 %4123 }
0x13de   : > { %v4133_v9 = vmul.f32 %v4124_v23, %v4109_v21 }
0x13e0   : > { %v4137_v24 = vmax.f32 %v4133_v9, 0.0 }
0x13e1   : > { %v4129_v11 = vpop.permute.xlu1 %4128 }
0x13e2   : > { %4141 = vst.msk [vmem:[%s389_s22 + $0x10] sm:$0xff] %vm2518_vm3, %v4137_v24  ;;  %v4134_v27 = vmul.f32 %v4129_v11, %v4110_v26 }
0x13e4   : > { %v4138_v28 = vmax.f32 %v4134_v27, 0.0 }
0x13e6   : > { %4142 = vst.msk [vmem:[%s389_s22 + $0x18] sm:$0xff] %vm2518_vm3, %v4138_v28 }
0x13e7 PF: > { %s19_s30 = sadd.s32 1, %s5571_s30  }
0x13e8   : > { %p16_p4 = scmp.ge.s32.totalorder %s19_s30, 4  }
0x13ea   :  { %18 = sbr.rel (!%p16_p4) target bundleno = 1 (0x1), region = 127 }

</bundles_post_ra>
